<compile_context>
chip_gen: v5e
topology: v5e:2x2
jax: 0.10.0
libtpu: 0.0.40
codegen_flags: <defaults>
</compile_context>

<pallas_src>
import jax
import jax.numpy as jnp
import numpy as np
from jax.experimental import pallas as pl
from jax.experimental.pallas import tpu as pltpu

IN_DIM = 25
OUT_DIM = 64
NUM_KERNEL = 64
KERNEL_SIZES = (2, 3, 4)
KMAX = max(KERNEL_SIZES)
C3 = NUM_KERNEL * len(KERNEL_SIZES)    # 192 fused conv channels
OUT_PAD = 128                          # lane-dense output width (sliced to 64)


def _round_up(v, m):
    return (v + m - 1) // m * m


def _ylmconv_kernel(x_ref, w_ref, b_ref, m_ref, lw_ref, lb_ref, out_ref):
    """One batch tile: fused conv(K=2,3,4) -> tanh -> masked max-pool -> linear."""
    tb, _, d = x_ref.shape
    lw_rows = m_ref.shape[0]                       # Lw: evaluated window rows

    # In-kernel im2col: h[b, t, :] = sum_k x[b, t+k, :] @ W[k].
    # Slices are taken on the f32 upcast (robust layout path for any operand
    # dtype); operands are cast back to the matmul dtype just before the MXU.
    x32 = x_ref[...].astype(jnp.float32)           # (tb, Lp, 25)

    x0 = x32[:, 0:lw_rows, :].reshape(tb * lw_rows, d)
    acc = jnp.dot(x0.astype(w_ref.dtype), w_ref[0],
                  preferred_element_type=jnp.float32)
    for k in range(1, KMAX):                       # static unroll, 4 taps total
        xk = x32[:, k:k + lw_rows, :].reshape(tb * lw_rows, d)
        acc = acc + jnp.dot(xk.astype(w_ref.dtype), w_ref[k],
                            preferred_element_type=jnp.float32)

    h = jnp.tanh(acc + b_ref[...])                 # (tb*Lw, 192) f32, in [-1, 1]
    # Additive {0, -3} mask: invalid window positions land in [-4, -2] and can
    # never beat a valid tanh value in the max.  No -inf in the datapath.
    h = h.reshape(tb, lw_rows, C3) + m_ref[...]
    pooled = jnp.max(h, axis=1)                    # (tb, 192) f32

    out = jnp.dot(pooled, lw_ref[...],
                  preferred_element_type=jnp.float32) + lb_ref[...]
    out_ref[...] = out.astype(out_ref.dtype)       # (tb, 128) lane-dense store


def _pack_params(params, matmul_dtype):
    """Fuse the three conv branches into a tap-indexed (KMAX, 25, 192) weight
    plus a (1, 192) bias; pad the linear layer to 128 lane-dense outputs."""
    wf = jnp.zeros((KMAX, IN_DIM, C3), jnp.float32)
    b_parts = []
    for i, K in enumerate(KERNEL_SIZES):
        w, b = params["conv%d" % K]                          # (C, 1, K, D), (C,)
        wk = jnp.transpose(w.astype(jnp.float32)[:, 0], (1, 2, 0))   # (K, D, C)
        wf = wf.at[:K, :, i * NUM_KERNEL:(i + 1) * NUM_KERNEL].set(wk)
        b_parts.append(b.astype(jnp.float32))
    bf = jnp.concatenate(b_parts).reshape(1, C3)
    lw, lb = params["lin"]                                   # (64, 192), (64,)
    lw_p = jnp.zeros((C3, OUT_PAD), jnp.float32)
    lw_p = lw_p.at[:, :OUT_DIM].set(jnp.transpose(lw.astype(jnp.float32)))
    lb_p = jnp.zeros((1, OUT_PAD), jnp.float32)
    lb_p = lb_p.at[0, :OUT_DIM].set(lb.astype(jnp.float32))
    # Conv matmul operands may be bf16; biases and the linear layer stay f32.
    return wf.astype(matmul_dtype), bf, lw_p, lb_p


def _make_mask(L, Lw):
    """(Lw, 192) additive mask: 0 where window position t is valid for that
    column's kernel size (columns [64*i, 64*(i+1)) <-> K = i + 2), else -3."""
    t = jnp.arange(Lw, dtype=jnp.int32)[:, None]
    kb = (jnp.arange(C3, dtype=jnp.int32) // NUM_KERNEL)[None, :]
    return jnp.where(t < (L - 1 - kb), 0.0, -3.0).astype(jnp.float32)


def _choose_tb(B, Lw, max_rows):
    """Batch tile: >= 4 grid steps when B allows (>= 2 per v7x TensorCore for
    double-buffered DMA), tb a multiple of 8 (sublane-aligned output block),
    tb*Lw capped at max_rows to bound the per-step VMEM footprint."""
    if B <= 8:
        return B
    cap = max(8, (max_rows // max(Lw, 1)) // 8 * 8)
    tb = min(max((B // 4) // 8 * 8, 8), cap)
    while tb > 8 and B % tb:
        tb -= 8
    if B % tb:
        tb = B
    return tb


def ylm_conv_forward(x, params, *, tb=None, matmul_dtype=jnp.bfloat16,
                     max_rows=8192):
    """Pallas forward.  x: (B, L, 25) float32 -> (B, 64) float32."""
    B, L, D = x.shape
    assert D == IN_DIM and L >= KMAX
    Lw = _round_up(L, 16)          # evaluated window rows (free sublane merge)
    Lp = Lw + 8                    # head-room for the k = 1..3 shifted slices
    if tb is None:
        tb = _choose_tb(B, Lw, max_rows)
    assert B % tb == 0

    # Single cheap prep pass: pad L and (by default) cast to bf16.  No im2col
    # packing / no 5x-inflated intermediate in HBM.
    x_p = jnp.pad(x.astype(jnp.float32),
                  ((0, 0), (0, Lp - L), (0, 0))).astype(matmul_dtype)
    w_f, b_f, lw_p, lb_p = _pack_params(params, matmul_dtype)
    mask = _make_mask(L, Lw)

    out = pl.pallas_call(
        _ylmconv_kernel,
        out_shape=jax.ShapeDtypeStruct((B, OUT_PAD), jnp.float32),
        grid=(B // tb,),
        in_specs=[
            # (pipeline_mode=pl.Buffered(3) on this spec is a cheap sweep knob
            #  once tile sizes are settled; default double-buffering kept.)
            pl.BlockSpec((tb, Lp, IN_DIM), lambda i: (i, 0, 0)),
            pl.BlockSpec((KMAX, IN_DIM, C3), lambda i: (0, 0, 0)),
            pl.BlockSpec((1, C3), lambda i: (0, 0)),
            pl.BlockSpec((Lw, C3), lambda i: (0, 0)),
            pl.BlockSpec((C3, OUT_PAD), lambda i: (0, 0)),
            pl.BlockSpec((1, OUT_PAD), lambda i: (0, 0)),
        ],
        out_specs=pl.BlockSpec((tb, OUT_PAD), lambda i: (i, 0)),
        compiler_params=pltpu.CompilerParams(
            dimension_semantics=("parallel",),
            vmem_limit_bytes=64 * 1024 * 1024),
    )(x_p, w_f, b_f, mask, lw_p, lb_p)
    return out[:, :OUT_DIM]


def init_params(key):
    """Deterministic parameters, shapes matching the PyTorch module."""
    params = {}
    keys = jax.random.split(key, 8)
    i = 0
    for K in KERNEL_SIZES:
        fan_in = 1 * K * IN_DIM
        bound = 1.0 / float(np.sqrt(fan_in))
        w = jax.random.uniform(keys[i], (NUM_KERNEL, 1, K, IN_DIM),
                               jnp.float32, -bound, bound)
        b = jax.random.uniform(keys[i + 1], (NUM_KERNEL,),
                               jnp.float32, -bound, bound)
        params["conv%d" % K] = (w, b)
        i += 2
    fan_in = 3 * NUM_KERNEL
    bound = 1.0 / float(np.sqrt(fan_in))
    lw = jax.random.uniform(keys[6], (OUT_DIM, 3 * NUM_KERNEL),
                            jnp.float32, -bound, bound)
    lb = jax.random.uniform(keys[7], (OUT_DIM,), jnp.float32, -bound, bound)
    params["lin"] = (lw, lb)
    return params


def ref_forward(x, params):
    """Pure-JAX reference mirroring the PyTorch forward exactly."""
    B, L, D = x.shape
    feats = []
    for K in KERNEL_SIZES:
        w, b = params["conv%d" % K]
        w = w.reshape(NUM_KERNEL, K, D)
        lk = L - K + 1
        conv = jnp.zeros((B, lk, NUM_KERNEL), jnp.float32)
        for k in range(K):
            conv = conv + jnp.einsum("bld,cd->blc", x[:, k:k + lk, :], w[:, k, :])
        h = jnp.tanh(conv + b[None, None, :])
        feats.append(jnp.max(h, axis=1))
    feat = jnp.concatenate(feats, axis=-1)
    lw, lb = params["lin"]
    return feat @ lw.T + lb


if __name__ == "__main__":
    key = jax.random.PRNGKey(0)
    pkey, xkey = jax.random.split(key)
    params = init_params(pkey)

    B, L = 16, 8                      # batch, sequence of Ylm rows
    x = jax.random.normal(xkey, (B, L, IN_DIM), jnp.float32)

    ref = ref_forward(x, params)

    # Default path: bf16 matmul operands, f32 accumulation (v5e/v6e/v7x MXU).
    out = jax.block_until_ready(ylm_conv_forward(x, params))
    assert out.shape == (B, OUT_DIM), out.shape
    np.testing.assert_allclose(np.asarray(out), np.asarray(ref),
                               rtol=5e-2, atol=5e-2)

    # f32-operand path: bit-tight comparison with the reference.
    out_f32 = jax.block_until_ready(
        ylm_conv_forward(x, params, matmul_dtype=jnp.float32))
    np.testing.assert_allclose(np.asarray(out_f32), np.asarray(ref),
                               rtol=1e-5, atol=1e-5)

    print("KERNEL_OK")
</pallas_src>

<mosaic_0001>
module attributes {stable_mosaic.version = 11 : i64} {
  func.func @_ylmconv_kernel(%arg0: i32, %arg1: memref<8x24x25xbf16, #tpu.memory_space<vmem>>, %arg2: memref<4x25x192xbf16, #tpu.memory_space<vmem>>, %arg3: memref<1x192xf32, #tpu.memory_space<vmem>>, %arg4: memref<16x192xf32, #tpu.memory_space<vmem>>, %arg5: memref<192x128xf32, #tpu.memory_space<vmem>>, %arg6: memref<1x128xf32, #tpu.memory_space<vmem>>, %arg7: memref<8x128xf32, #tpu.memory_space<vmem>>) attributes {dimension_semantics = [#tpu.dimension_semantics<parallel>], iteration_bounds = array<i64: 2>, scalar_prefetch = 0 : i64, scratch_operands = 0 : i64, tpu.core_type = #tpu.core_type<tc>, window_params = [{transform_indices = @transform_0, window_bounds = array<i64: 8, 24, 25>}, {pipeline_mode = #tpu.pipeline_mode<synchronous>, transform_indices = @transform_1, window_bounds = array<i64: 4, 25, 192>}, {pipeline_mode = #tpu.pipeline_mode<synchronous>, transform_indices = @transform_2, window_bounds = array<i64: 1, 192>}, {pipeline_mode = #tpu.pipeline_mode<synchronous>, transform_indices = @transform_3, window_bounds = array<i64: 16, 192>}, {pipeline_mode = #tpu.pipeline_mode<synchronous>, transform_indices = @transform_4, window_bounds = array<i64: 192, 128>}, {pipeline_mode = #tpu.pipeline_mode<synchronous>, transform_indices = @transform_5, window_bounds = array<i64: 1, 128>}, {transform_indices = @transform_6, window_bounds = array<i64: 8, 128>}]} {
    %c0 = arith.constant 0 : index
    %c0_0 = arith.constant 0 : index
    %c0_1 = arith.constant 0 : index
    %0 = vector.load %arg1[%c0, %c0_0, %c0_1] : memref<8x24x25xbf16, #tpu.memory_space<vmem>>, vector<8x24x25xbf16>
    %1 = arith.extf %0 : vector<8x24x25xbf16> to vector<8x24x25xf32>
    %2 = vector.extract_strided_slice %1 {offsets = [0, 0, 0], sizes = [8, 16, 25], strides = [1, 1, 1]} : vector<8x24x25xf32> to vector<8x16x25xf32>
    %3 = vector.shape_cast %2 : vector<8x16x25xf32> to vector<128x25xf32>
    %4 = arith.truncf %3 : vector<128x25xf32> to vector<128x25xbf16>
    %c0_2 = arith.constant 0 : index
    %c0_3 = arith.constant 0 : index
    %c0_4 = arith.constant 0 : index
    %5 = vector.load %arg2[%c0_2, %c0_3, %c0_4] : memref<4x25x192xbf16, #tpu.memory_space<vmem>>, vector<1x25x192xbf16>
    %6 = vector.shape_cast %5 : vector<1x25x192xbf16> to vector<25x192xbf16>
    %cst = arith.constant dense<0.000000e+00> : vector<128x192xf32>
    %7 = tpu.matmul %4, %6, %cst {dimension_numbers = #tpu.dot_dimension_numbers<[1], [0], [0], [1], [0, 0, 1, 1], [], []>} : vector<128x25xbf16>, vector<25x192xbf16>, vector<128x192xf32> -> vector<128x192xf32>
    %8 = vector.extract_strided_slice %1 {offsets = [0, 1, 0], sizes = [8, 16, 25], strides = [1, 1, 1]} : vector<8x24x25xf32> to vector<8x16x25xf32>
    %9 = vector.shape_cast %8 : vector<8x16x25xf32> to vector<128x25xf32>
    %10 = arith.truncf %9 : vector<128x25xf32> to vector<128x25xbf16>
    %c1 = arith.constant 1 : index
    %c0_5 = arith.constant 0 : index
    %c0_6 = arith.constant 0 : index
    %11 = vector.load %arg2[%c1, %c0_5, %c0_6] : memref<4x25x192xbf16, #tpu.memory_space<vmem>>, vector<1x25x192xbf16>
    %12 = vector.shape_cast %11 : vector<1x25x192xbf16> to vector<25x192xbf16>
    %cst_7 = arith.constant dense<0.000000e+00> : vector<128x192xf32>
    %13 = tpu.matmul %10, %12, %cst_7 {dimension_numbers = #tpu.dot_dimension_numbers<[1], [0], [0], [1], [0, 0, 1, 1], [], []>} : vector<128x25xbf16>, vector<25x192xbf16>, vector<128x192xf32> -> vector<128x192xf32>
    %14 = arith.addf %7, %13 : vector<128x192xf32>
    %15 = vector.extract_strided_slice %1 {offsets = [0, 2, 0], sizes = [8, 16, 25], strides = [1, 1, 1]} : vector<8x24x25xf32> to vector<8x16x25xf32>
    %16 = vector.shape_cast %15 : vector<8x16x25xf32> to vector<128x25xf32>
    %17 = arith.truncf %16 : vector<128x25xf32> to vector<128x25xbf16>
    %c2 = arith.constant 2 : index
    %c0_8 = arith.constant 0 : index
    %c0_9 = arith.constant 0 : index
    %18 = vector.load %arg2[%c2, %c0_8, %c0_9] : memref<4x25x192xbf16, #tpu.memory_space<vmem>>, vector<1x25x192xbf16>
    %19 = vector.shape_cast %18 : vector<1x25x192xbf16> to vector<25x192xbf16>
    %cst_10 = arith.constant dense<0.000000e+00> : vector<128x192xf32>
    %20 = tpu.matmul %17, %19, %cst_10 {dimension_numbers = #tpu.dot_dimension_numbers<[1], [0], [0], [1], [0, 0, 1, 1], [], []>} : vector<128x25xbf16>, vector<25x192xbf16>, vector<128x192xf32> -> vector<128x192xf32>
    %21 = arith.addf %14, %20 : vector<128x192xf32>
    %22 = vector.extract_strided_slice %1 {offsets = [0, 3, 0], sizes = [8, 16, 25], strides = [1, 1, 1]} : vector<8x24x25xf32> to vector<8x16x25xf32>
    %23 = vector.shape_cast %22 : vector<8x16x25xf32> to vector<128x25xf32>
    %24 = arith.truncf %23 : vector<128x25xf32> to vector<128x25xbf16>
    %c3 = arith.constant 3 : index
    %c0_11 = arith.constant 0 : index
    %c0_12 = arith.constant 0 : index
    %25 = vector.load %arg2[%c3, %c0_11, %c0_12] : memref<4x25x192xbf16, #tpu.memory_space<vmem>>, vector<1x25x192xbf16>
    %26 = vector.shape_cast %25 : vector<1x25x192xbf16> to vector<25x192xbf16>
    %cst_13 = arith.constant dense<0.000000e+00> : vector<128x192xf32>
    %27 = tpu.matmul %24, %26, %cst_13 {dimension_numbers = #tpu.dot_dimension_numbers<[1], [0], [0], [1], [0, 0, 1, 1], [], []>} : vector<128x25xbf16>, vector<25x192xbf16>, vector<128x192xf32> -> vector<128x192xf32>
    %28 = arith.addf %21, %27 : vector<128x192xf32>
    %c0_14 = arith.constant 0 : index
    %c0_15 = arith.constant 0 : index
    %29 = vector.load %arg3[%c0_14, %c0_15] : memref<1x192xf32, #tpu.memory_space<vmem>>, vector<1x192xf32>
    %30 = vector.broadcast %29 : vector<1x192xf32> to vector<128x192xf32>
    %31 = arith.addf %28, %30 : vector<128x192xf32>
    %32 = math.tanh %31 : vector<128x192xf32>
    %33 = vector.shape_cast %32 : vector<128x192xf32> to vector<8x16x192xf32>
    %c0_16 = arith.constant 0 : index
    %c0_17 = arith.constant 0 : index
    %34 = vector.load %arg4[%c0_16, %c0_17] : memref<16x192xf32, #tpu.memory_space<vmem>>, vector<16x192xf32>
    %35 = vector.shape_cast %34 : vector<16x192xf32> to vector<1x16x192xf32>
    %36 = vector.broadcast %35 : vector<1x16x192xf32> to vector<8x16x192xf32>
    %37 = arith.addf %33, %36 : vector<8x16x192xf32>
    %cst_18 = arith.constant dense<0xFF800000> : vector<8x192xf32>
    %38 = vector.multi_reduction <maximumf>, %37, %cst_18 [1] : vector<8x16x192xf32> to vector<8x192xf32>
    %c0_19 = arith.constant 0 : index
    %c0_20 = arith.constant 0 : index
    %39 = vector.load %arg5[%c0_19, %c0_20] : memref<192x128xf32, #tpu.memory_space<vmem>>, vector<192x128xf32>
    %cst_21 = arith.constant dense<0.000000e+00> : vector<8x128xf32>
    %40 = tpu.matmul %38, %39, %cst_21 {dimension_numbers = #tpu.dot_dimension_numbers<[1], [0], [0], [1], [0, 0, 1, 1], [], []>} : vector<8x192xf32>, vector<192x128xf32>, vector<8x128xf32> -> vector<8x128xf32>
    %c0_22 = arith.constant 0 : index
    %c0_23 = arith.constant 0 : index
    %41 = vector.load %arg6[%c0_22, %c0_23] : memref<1x128xf32, #tpu.memory_space<vmem>>, vector<1x128xf32>
    %42 = vector.broadcast %41 : vector<1x128xf32> to vector<8x128xf32>
    %43 = arith.addf %40, %42 : vector<8x128xf32>
    %c0_24 = arith.constant 0 : index
    %c0_25 = arith.constant 0 : index
    %44 = vector.load %arg7[%c0_24, %c0_25] : memref<8x128xf32, #tpu.memory_space<vmem>>, vector<8x128xf32>
    tpu.vector_store %arg7[%c0_24, %c0_25], %43 {strides = array<i32>} : memref<8x128xf32, #tpu.memory_space<vmem>>, vector<8x128xf32>,
    return
  }
  func.func @transform_0(%arg0: i32) -> (i32, i32, i32) {
    %c0_i32 = arith.constant 0 : i32
    %c0_i32_0 = arith.constant 0 : i32
    %c0_i32_1 = arith.constant 0 : i32
    return %arg0, %c0_i32, %c0_i32_0 : i32, i32, i32
  }
  func.func @transform_1(%arg0: i32) -> (i32, i32, i32) {
    %c0_i32 = arith.constant 0 : i32
    %c0_i32_0 = arith.constant 0 : i32
    %c0_i32_1 = arith.constant 0 : i32
    %c0_i32_2 = arith.constant 0 : i32
    return %c0_i32, %c0_i32_0, %c0_i32_1 : i32, i32, i32
  }
  func.func @transform_2(%arg0: i32) -> (i32, i32) {
    %c0_i32 = arith.constant 0 : i32
    %c0_i32_0 = arith.constant 0 : i32
    %c0_i32_1 = arith.constant 0 : i32
    return %c0_i32, %c0_i32_0 : i32, i32
  }
  func.func @transform_3(%arg0: i32) -> (i32, i32) {
    %c0_i32 = arith.constant 0 : i32
    %c0_i32_0 = arith.constant 0 : i32
    %c0_i32_1 = arith.constant 0 : i32
    return %c0_i32, %c0_i32_0 : i32, i32
  }
  func.func @transform_4(%arg0: i32) -> (i32, i32) {
    %c0_i32 = arith.constant 0 : i32
    %c0_i32_0 = arith.constant 0 : i32
    %c0_i32_1 = arith.constant 0 : i32
    return %c0_i32, %c0_i32_0 : i32, i32
  }
  func.func @transform_5(%arg0: i32) -> (i32, i32) {
    %c0_i32 = arith.constant 0 : i32
    %c0_i32_0 = arith.constant 0 : i32
    %c0_i32_1 = arith.constant 0 : i32
    return %c0_i32, %c0_i32_0 : i32, i32
  }
  func.func @transform_6(%arg0: i32) -> (i32, i32) {
    %c0_i32 = arith.constant 0 : i32
    %c0_i32_0 = arith.constant 0 : i32
    return %arg0, %c0_i32 : i32, i32
  }
}

</mosaic_0001>

<bundles_post_ra>
// kernel: tpu_custom_call.1
= control target key start
LH: loop header
LB: loop body
LE: loop exit
PB: predicated region body
PF: predicated region fallthrough
CT: control target
= control target key end

     0   :  { %11 = vsyncpa [#allocation3], 0  ;;  %s2817_s0 = inlined_call_operand.vmem [shape: bf16[16,24,25], index: 0, kind: input, shape index: {}]   ;;  %s2818_s1 = inlined_call_operand.vmem [shape: bf16[4,25,192], index: 1, kind: input, shape index: {}]   ;;  %s2819_s2 = inlined_call_operand.vmem [shape: f32[1,192], index: 2, kind: input, shape index: {}]   ;;  %s2820_s3 = inlined_call_operand.vmem [shape: f32[16,192], index: 3, kind: input, shape index: {}]   ;;  %s2821_s4 = inlined_call_operand.hbm [shape: f32[192,128], index: 4, kind: input, shape index: {}]   ;;  %s2822_s5 = inlined_call_operand.vmem [shape: f32[1,128], index: 5, kind: input, shape index: {}]   ;;  %s2823_s6 = inlined_call_operand.hbm [shape: f32[16,128], index: 6, kind: output, shape index: {}]  }
   0x1   :  { %12 = vsyncpa [#allocation4], 0 }
   0x2   :  { %14 = vsyncpa [#allocation4 + $0x1], 0  ;;  %s2135_s21 = smov 0   ;;  %s2137_s22 = smov 0  }
   0x3   :  { %s2139_s23 = smov 0   ;;  %s2141_s24 = smov 0  }
   0x4 LB: > { %s2156_s25 = sadd.s32 4294967295, %s2094_s24   ;;  %s1650_s26 = sadd.s32 4294967294, %s2094_s24   ;;  %s2094_s24 = sphi %s2141_s24, %s2829_s24   ;;  %s2090_s23 = sphi %s2139_s23, %s2828_s23   ;;  %s2086_s22 = sphi %s2137_s22, %s2827_s22   ;;  %s2082_s21 = sphi %s2135_s21, %s2826_s21  }
   0x5   : > { %s2160_s27 = sadd.s32 1, %s2094_s24   ;;  %s158_s28 = sadd.s32 1, %s2090_s23 }
   0x6   : > { %s155_s29 = ssub.s32 %s2094_s24, %s2160_s27  ;;  %p168_p0 = scmp.ne.s32.totalorder %s2090_s23, %s2086_s22 }
   0x7   : > { %p156_p1 = scmp.eq.s32.totalorder %s155_s29, 0  ;;  %p169_p2 = scmp.eq.s32.totalorder %s2156_s25, 1 }
   0x8   : > { %p174_p3 = scmp.ne.s32.totalorder %s2086_s22, %s2082_s21  ;;  %p175_p4 = scmp.eq.s32.totalorder %s1650_s26, 1 }
   0x9   : > { %s2171_s30 = scalar_select %p156_p1, %s2090_s23, %s158_s28  }
   0xa   : > { %p2173_p5 = por %p169_p2, %p168_p0  ;;  %p2177_p6 = por %p175_p4, %p174_p3 }
   0xb   : > { %p1651_p7 = scmp.ge.s32.totalorder %s2094_s24, 1  ;;  %p182_p8 = scmp.lt.s32.totalorder %s2094_s24, 3 }
   0xc   : > { %p1894_p9 = scmp.eq.s32.totalorder %s2156_s25, 0  ;;  %s202_s11 = sshll.u32 %s2821_s4, 4  ;;  %s203_s11 = int_to_ptr.hbm [resolvable:$true] %s202_s11 }
   0xd   : > { %p183_p10 = pnand %p1651_p7, %p182_p8  ;;  %s2096_s12 = smov [#allocation2]  }
   0xe   : > { %s204_s13 = sshll.u32 %s2096_s12, 4  ;;  %s2097_s14 = smov 128   ;;  %s205_s13 = int_to_ptr.vmem [resolvable:$true] %s204_s13 }
   0xf   : > { %p1886_p11 = pneg %p183_p10  ;;  %s2098_s15 = smov 8  }
  0x10   : > { %233 = sbr.rel (%p183_p10) target bundleno = 580 (0x244), region = 44 }
  0x11   : > { %p1887_p12 = pnand %p1894_p9, %p1886_p11 }
  0x13   : > { %1889 = dma.hbm_to_vmem [thread:$0]  (!%p1887_p12), %s203_s11, 3072, %s205_s13, [#allocation3], %s2097_s14, %s2097_s14, %s2098_s15  }
  0x15   : > { %2073 = dma.done.wait (%p1894_p9), [#allocation3], 3072  }
  0x16   : > { %2075 = vsyncadd (%p1894_p9), [#allocation3], 4294964224  ;;  %vm470_vm0 = vcmask 1043456   ;;  %s2194_s16 = sshll.u32 %s2156_s25, 3  ;;  %vm471_vm1 = vcmask 1044480   ;;  %v2099_v0 = vmov 65535  }
  0x17   : > { %p266_p13 = scmp.lt.s32.totalorder %s2194_s16, 15  ;;  %v472_v1 = vsel %vm470_vm0, 4294967295, %v2099_v0  ;;  %v1673_v3 = vld [vmem:[%s2818_s1 + $0x30] sm:$0xf]  ;;  %v1811_v4 = vld [vmem:[%s2818_s1 + $0x34] sm:$0x10]  ;;  %s1574_s14 = scalar_lea.hbm %s2823_s6, %s2194_s16 }
  0x18   : > { %v2199_v2 = vsel %vm471_vm1, %v472_v1, 0  ;;  %v1810_v5 = vld [vmem:[%s2818_s1 + $0x34] sm:$0xf]  ;;  %v1674_v6 = vor.u32 %v1811_v4, %v1673_v3  ;;  %v1675_v7 = vld [vmem:[%s2818_s1 + $0x38] sm:$0x10]  ;;  %vm357_vm2 = vcmask 1046528  }
  0x19   : > { %s267_s17 = scalar_select %p266_p13, %s2194_s16, 15  ;;  %v1705_v8 = vld [vmem:[%s2818_s1 + $0x10] sm:$0xf]  ;;  %v1807_v9 = vld [vmem:[%s2818_s1 + $0x14] sm:$0x10]  ;;  %v1678_v10 = vor.u32 %v1810_v5, %v1675_v7  ;;  %vm445_vm3 = vcmask 203776  }
  0x1a   : > { %v1706_v11 = vor.u32 %v1807_v9, %v1705_v8  ;;  %v1806_v12 = vld [vmem:[%s2818_s1 + $0x14] sm:$0xf]  ;;  %v1707_v13 = vld [vmem:[%s2818_s1 + $0x18] sm:$0x10]  ;;  %v1665_v14 = vld [vmem:[%s2818_s1 + $0x20] sm:$0xf]  ;;  %v475_v15 = vand.u32 %v1674_v6, %v2199_v2 }
  0x1b   : > { %s1879_s18 = smul.u32 12, %s267_s17  ;;  %v1710_v16 = vor.u32 %v1806_v12, %v1707_v13  ;;  %v1809_v17 = vld [vmem:[%s2818_s1 + $0x24] sm:$0xf0]  ;;  %v1808_v18 = vld [vmem:[%s2818_s1 + $0x24] sm:$0xf]  ;;  %v478_v20 = vand.u32 %v1678_v10, %v2199_v2  ;;  %vm724_vm4 = vcmask 1045504  }
  0x1c   : > { %v1667_v19 = vld [vmem:[%s2818_s1 + $0x28] sm:$0xf0]  ;;  %v621_v21 = vand.u32 %v1706_v11, %v2199_v2  ;;  %v1697_v22 = vld [vmem:[%s2818_s1] sm:$0xf]  ;;  %v1805_v23 = vld [vmem:[%s2818_s1 + $0x4] sm:$0xf0]  ;;  %486 = vmatpush.bf16.msra.mxu0 %v475_v15  ;;  %v1666_v26 = vor.u32 %v1809_v17, %v1665_v14 }
  0x1d   : > { %s2231_s9 = scalar_lea.vmem %s2817_s0, %s1879_s18  ;;  %v1804_v24 = vld [vmem:[%s2818_s1 + $0x4] sm:$0xf]  ;;  %v624_v25 = vand.u32 %v1710_v16, %v2199_v2  ;;  %v1670_v27 = vor.u32 %v1808_v18, %v1667_v19  ;;  %v1699_v28 = vld [vmem:[%s2818_s1 + $0x8] sm:$0xf0]  ;;  %535 = vmatpush.bf16.msra.mxu1 %v478_v20  ;;  %v1698_v31 = vor.u32 %v1805_v23, %v1697_v22  ;;  %v1777_v35 = vld [vmem:[%s2818_s1 + $0x70] sm:$0xf] }
  0x1e   : > { %v1821_v29 = vld [vmem:[%s2231_s9] sm:$0xff]   ;;  %v1868_v30 = vld [vmem:[%s2231_s9 + $0x8] sm:$0xff]   ;;  %632 = vmatpush.bf16.msra.mxu2 %v621_v21  ;;  %v1819_v36 = vld [vmem:[%s2818_s1 + $0x74] sm:$0x10]  ;;  %v1702_v38 = vor.u32 %v1804_v24, %v1699_v28  ;;  %vm1332_vm5 = vcmask 523264   ;;  %vm1498_vm6 = vcmask 1041409  }
  0x1f   : > { %v2260_v32 = vunpack.c.l.bf16 %v1821_v29  ;;  %v2262_v33 = vunpack.c.h.bf16 %v1821_v29  ;;  %v2264_v34 = vunpack.c.l.bf16 %v1868_v30  ;;  %v1818_v37 = vld [vmem:[%s2818_s1 + $0x74] sm:$0xf]  ;;  %681 = vmatpush.bf16.msra.mxu3 %v624_v25  ;;  %v1778_v39 = vor.u32 %v1819_v36, %v1777_v35  ;;  %v1779_v40 = vld [vmem:[%s2818_s1 + $0x78] sm:$0x10]  ;;  %v1741_v41 = vld [vmem:[%s2818_s1 + $0x50] sm:$0xf] }
  0x20   : > { %v1815_v42 = vld [vmem:[%s2818_s1 + $0x54] sm:$0x10]  ;;  %v1782_v46 = vor.u32 %v1818_v37, %v1779_v40  ;;  %v1814_v47 = vld [vmem:[%s2818_s1 + $0x54] sm:$0xf]  ;;  %487 = vmatpush.bf16.msra.mxu0 %v1666_v26  ;;  %v1743_v50 = vld [vmem:[%s2818_s1 + $0x58] sm:$0x10]  ;;  %v2302_v59 = vunpack.c.h.bf16 %v1868_v30 }
  0x21   : > { %v358_v43 = vrot.slane %v2260_v32, 1  ;;  %v359_v44 = vrot.slane %v2262_v33, 1  ;;  %v361_v45 = vrot.slane %v2264_v34, 1  ;;  %v1084_v48 = vand.u32 %v1778_v39, %v2199_v2  ;;  %536 = vmatpush.bf16.msra.mxu1 %v1670_v27  ;;  %v1869_v57 = vld [vmem:[%s2231_s9 + $0x10] sm:$0xff]   ;;  %v1870_v5 = vld [vmem:[%s2231_s9 + $0x18] sm:$0xff]   ;;  %v1871_v6 = vld [vmem:[%s2231_s9 + $0x20] sm:$0xff]  }
  0x22   : > { %v1742_v49 = vor.u32 %v1815_v42, %v1741_v41  ;;  %633 = vmatpush.bf16.msra.mxu2 %v1698_v31  ;;  %v1087_v53 = vand.u32 %v1782_v46, %v2199_v2  ;;  %v1746_v56 = vor.u32 %v1814_v47, %v1743_v50  ;;  %v2306_v60 = vunpack.c.l.bf16 %v1869_v57  ;;  %v1872_v16 = vld [vmem:[%s2231_s9 + $0x28] sm:$0xff]   ;;  %v1769_v20 = vld [vmem:[%s2818_s1 + $0x60] sm:$0xf]  ;;  %v1816_v22 = vld [vmem:[%s2818_s1 + $0x64] sm:$0xf]  ;;  %s262_s29 = sand.u32 1, %s2086_s22  }
  0x23   : > { %v360_v51 = vsel %vm357_vm2, %v358_v43, %v359_v44  ;;  %v362_v52 = vsel %vm357_vm2, %v359_v44, %v361_v45  ;;  %682 = vmatpush.bf16.msra.mxu3 %v1702_v38  ;;  %v2308_v61 = vunpack.c.h.bf16 %v1869_v57  ;;  %v363_v62 = vrot.slane %v2302_v59, 1  ;;  %v1817_v21 = vld [vmem:[%s2818_s1 + $0x64] sm:$0xf0]  ;;  %v1771_v24 = vld [vmem:[%s2818_s1 + $0x68] sm:$0xf0]  ;;  %v1873_v42 = vld [vmem:[%s2231_s9 + $0x30] sm:$0xff]  }
  0x24   : > { %v414_v54 = vpack.c.bf16 %v362_v52, %v360_v51  ;;  %v837_v55 = vand.u32 %v1742_v49, %v2199_v2  ;;  %v840_v58 = vand.u32 %v1746_v56, %v2199_v2  ;;  %v364_v63 = vrot.slane %v2306_v60, 1  ;;  %v1733_v25 = vld [vmem:[%s2818_s1 + $0x40] sm:$0xf]  ;;  %v1813_v26 = vld [vmem:[%s2818_s1 + $0x44] sm:$0xf0]  ;;  %v1874_v43 = vld [vmem:[%s2231_s9 + $0x38] sm:$0xff]  }
  0x25   : > { %1711 = vmatmul.msk.bf16.vlgmr.msra.gmra.mxu2 %vm445_vm3, %v1821_v29  ;;  %v366_v0 = vrot.slane %v2308_v61, 1  ;;  %v322_v4 = vpack.c.bf16 %v2306_v60, %v2302_v59  ;;  %v2323_v7 = vunpack.c.l.bf16 %v1870_v5  ;;  %v2325_v8 = vunpack.c.h.bf16 %v1870_v5  ;;  %v1735_v30 = vld [vmem:[%s2818_s1 + $0x48] sm:$0xf0]  ;;  %s1656_s10 = sshll.u32 %s262_s29, 3  ;;  %s1578_s17 = sshll.u32 %s1574_s14, 4  ;;  %s1579_s17 = int_to_ptr.hbm [resolvable:$true] %s1578_s17 }
  0x26   : > { %1095 = vmatpush.bf16.msrb.mxu2 %v1084_v48  ;;  %1679 = vmatmul.msk.bf16.vlgmr.msra.gmra.mxu0 %vm445_vm3, %v414_v54  ;;  %v365_v1 = vsel %vm357_vm2, %v363_v62, %v364_v63  ;;  %v2327_v9 = vunpack.c.l.bf16 %v1871_v6  ;;  %v2337_v17 = vunpack.c.h.bf16 %v1871_v6  ;;  %v2341_v18 = vunpack.c.l.bf16 %v1872_v16  ;;  %s264_s15 = scalar_lea.vmem [#allocation5], %s1656_s10  ;;  %s1564_s19 = scalar_lea.sflag [#allocation4], %s262_s29 }
  0x27   : > { %1144 = vmatpush.bf16.msrb.mxu3 %v1087_v53  ;;  %1687 = vmatmul.msk.bf16.vlgmr.msra.gmra.mxu1 %vm445_vm3, %v414_v54  ;;  %v367_v2 = vsel %vm357_vm2, %v364_v63, %v366_v0  ;;  %v368_v10 = vrot.slane %v2323_v7, 1  ;;  %v369_v11 = vrot.slane %v2325_v8, 1  ;;  %v2343_v19 = vunpack.c.h.bf16 %v1872_v16  ;;  %v1875_v53 = vld [vmem:[%s2231_s9 + $0x40] sm:$0xff]   ;;  %s1576_s18 = sshll.u32 %s264_s15, 4  ;;  %s2042_s20 = sshra.s32 %s1579_s17, 4  ;;  %s1577_s18 = int_to_ptr.vmem [resolvable:$true] %s1576_s18  ;;  %s2043_s20 = int_to_ptr.hbm [resolvable:$true] %s2042_s20 }
  0x28   : > { %1719 = vmatmul.msk.bf16.vlgmr.msra.gmra.mxu3 %vm445_vm3, %v1821_v29  ;;  %848 = vmatpush.bf16.msrb.mxu0 %v837_v55  ;;  %v415_v3 = vpack.c.bf16 %v367_v2, %v365_v1  ;;  %v371_v12 = vrot.slane %v2327_v9, 1  ;;  %v1770_v23 = vor.u32 %v1817_v21, %v1769_v20  ;;  %v1774_v27 = vor.u32 %v1816_v22, %v1771_v24  ;;  %v1812_v29 = vld [vmem:[%s2818_s1 + $0x44] sm:$0xf]  ;;  %v1878_v20 = vld [vmem:[%s2231_s9 + $0x58] sm:$0xff]   ;;  %s2044_s26 = scalar_lea.hbm %s2043_s20, 8  ;;  %s2048_s25 = scalar_lea.hbm %s2823_s6, 16 }
  0x29   : > { %897 = vmatpush.bf16.msrb.mxu1 %v840_v58  ;;  %v370_v13 = vsel %vm357_vm2, %v368_v10, %v369_v11  ;;  %v1734_v28 = vor.u32 %v1813_v26, %v1733_v25  ;;  %v1738_v31 = vor.u32 %v1812_v29, %v1735_v30  ;;  %v373_v35 = vrot.slane %v2337_v17, 1  ;;  %p2045_p0 = scmp.ne.s32.totalorder %s2043_s20, %s2044_s26  ;;  %p2049_p3 = scmp.lt.s32.totalorder %s2043_s20, %s2823_s6 }
  0x2a   : > { %v372_v14 = vsel %vm357_vm2, %v369_v11, %v371_v12  ;;  %1096 = vmatpush.bf16.msrb.mxu2 %v1770_v23  ;;  %v374_v36 = vrot.slane %v2341_v18, 1  ;;  %v376_v37 = vrot.slane %v2343_v19, 1  ;;  %v324_v41 = vpack.c.bf16 %v2341_v18, %v2337_v17  ;;  %p2050_p4 = scmp.lt.s32.totalorder %s2048_s25, %s2044_s26 }
  0x2b   : > { %v416_v15 = vpack.c.bf16 %v372_v14, %v370_v13  ;;  %1145 = vmatpush.bf16.msrb.mxu3 %v1774_v27  ;;  %v2382_v44 = vunpack.c.l.bf16 %v1873_v42  ;;  %v2384_v45 = vunpack.c.h.bf16 %v1873_v42  ;;  %v2386_v46 = vunpack.c.l.bf16 %v1874_v43  ;;  %p2046_p1 = pnand %p2045_p0, %p2173_p5 }
  0x2c   : > { %849 = vmatpush.bf16.msrb.mxu0 %v1734_v28  ;;  %v375_v38 = vsel %vm357_vm2, %v373_v35, %v374_v36  ;;  %v377_v39 = vsel %vm357_vm2, %v374_v36, %v376_v37  ;;  %v2396_v54 = vunpack.c.h.bf16 %v1874_v43  ;;  %v2400_v55 = vunpack.c.l.bf16 %v1875_v53  ;;  %p2051_p7 = por %p2050_p4, %p2049_p3 }
  0x2d   : > { %898 = vmatpush.bf16.msrb.mxu1 %v1738_v31  ;;  %v417_v40 = vpack.c.bf16 %v377_v39, %v375_v38  ;;  %v378_v47 = vrot.slane %v2382_v44, 1  ;;  %v379_v48 = vrot.slane %v2384_v45, 1  ;;  %v381_v49 = vrot.slane %v2386_v46, 1  ;;  %p2047_p2 = pneg %p2046_p1 }
  0x2e   : > { %v2402_v56 = vunpack.c.h.bf16 %v1875_v53  ;;  %v383_v57 = vrot.slane %v2396_v54, 1  ;;  %v384_v58 = vrot.slane %v2400_v55, 1  ;;  %v326_v2 = vpack.c.bf16 %v2400_v55, %v2396_v54 }
  0x2f   : > { %v380_v50 = vsel %vm357_vm2, %v378_v47, %v379_v48  ;;  %v382_v51 = vsel %vm357_vm2, %v379_v48, %v381_v49  ;;  %v2435_v22 = vunpack.c.l.bf16 %v1878_v20  ;;  %v2437_v23 = vunpack.c.h.bf16 %v1878_v20  ;;  %p2052_p8 = pnand %p2051_p7, %p2047_p2 }
  0x30   : > { %v418_v52 = vpack.c.bf16 %v382_v51, %v380_v50  ;;  %v386_v62 = vrot.slane %v2402_v56, 1  ;;  %v385_v63 = vsel %vm357_vm2, %v383_v57, %v384_v58  ;;  %v725_v31 = vrot.slane %v2260_v32, 2 }
  0x31   : > { %v394_v25 = vrot.slane %v2435_v22, 1  ;;  %v396_v26 = vrot.slane %v2437_v23, 1  ;;  %v726_v35 = vrot.slane %v2262_v33, 2  ;;  %v728_v36 = vrot.slane %v2264_v34, 2 }
  0x32   : > { %v387_v0 = vsel %vm357_vm2, %v384_v58, %v386_v62  ;;  %v972_v37 = vrot.slane %v2260_v32, 3  ;;  %v973_v38 = vrot.slane %v2262_v33, 3  ;;  %v975_v39 = vrot.slane %v2264_v34, 3 }
  0x33   : > { %v419_v1 = vpack.c.bf16 %v387_v0, %v385_v63  ;;  %v397_v28 = vsel %vm357_vm2, %v394_v25, %v396_v26  ;;  %v730_v34 = vrot.slane %v2302_v59, 2  ;;  %v731_v58 = vrot.slane %v2306_v60, 2 }
  0x34   : > { %v976_v43 = vsel %vm471_vm1, %v973_v38, %v975_v39  ;;  %v733_v62 = vrot.slane %v2308_v61, 2  ;;  %v977_v63 = vrot.slane %v2302_v59, 3  ;;  %v978_v0 = vrot.slane %v2306_v60, 3 }
  0x35   : > { %1712 = vmatmul.msk.bf16.gmra.mxu2 %vm445_vm3, %v322_v4  ;;  %vm1500_vm7 = vcmask 1042434   ;;  %vm1502_vm8 = vcmask 1043459   ;;  %vm1504_vm9 = vcmask 1044484   ;;  %vm1506_vm10 = vcmask 1045509  }
  0x36   : > { %1680 = vmatmul.msk.bf16.gmra.mxu0 %vm445_vm3, %v415_v3  ;;  %vm1508_vm11 = vcmask 1046534   ;;  %vm1510_vm12 = vcmask 1047559  }
  0x37   : > { %1688 = vmatmul.msk.bf16.gmra.mxu1 %vm445_vm3, %v415_v3  ;;  %v1876_v3 = vld [vmem:[%s2231_s9 + $0x48] sm:$0xff]  }
  0x38   : > { %1720 = vmatmul.msk.bf16.gmra.mxu3 %vm445_vm3, %v322_v4  ;;  %v1877_v4 = vld [vmem:[%s2231_s9 + $0x50] sm:$0xff]   ;;  %v2419_v6 = vunpack.c.h.bf16 %v1876_v3 }
  0x39   : > { %v2421_v10 = vunpack.c.l.bf16 %v1877_v4  ;;  %v2431_v21 = vunpack.c.h.bf16 %v1877_v4  ;;  %v979_v4 = vsel %vm471_vm1, %v977_v63, %v978_v0  ;;  %v743_v63 = vrot.slane %v2343_v19, 2 }
  0x3a   : > { %v389_v12 = vrot.slane %v2419_v6, 1 }
  0x3b   : > { %v391_v13 = vrot.slane %v2421_v10, 1  ;;  %v393_v24 = vrot.slane %v2431_v21, 1  ;;  %v328_v30 = vpack.c.bf16 %v2435_v22, %v2431_v21 }
  0x3d   : > { %v395_v27 = vsel %vm357_vm2, %v393_v24, %v394_v25  ;;  %v735_v25 = vrot.slane %v2323_v7, 2 }
  0x3e   : > { %v421_v29 = vpack.c.bf16 %v397_v28, %v395_v27 }
  0x45   : > { %1713 = vmatmul.msk.bf16.gmra.mxu2 %vm445_vm3, %v1870_v5 }
  0x46   : > { %1681 = vmatmul.msk.bf16.gmra.mxu0 %vm445_vm3, %v416_v15 }
  0x47   : > { %1689 = vmatmul.msk.bf16.gmra.mxu1 %vm445_vm3, %v416_v15  ;;  %v392_v15 = vsel %vm357_vm2, %v389_v12, %v391_v13 }
  0x48   : > { %1721 = vmatmul.msk.bf16.gmra.mxu3 %vm445_vm3, %v1870_v5  ;;  %v2417_v5 = vunpack.c.l.bf16 %v1876_v3 }
  0x4a   : > { %v388_v11 = vrot.slane %v2417_v5, 1 }
  0x4c   : > { %v390_v14 = vsel %vm357_vm2, %v388_v11, %v389_v12 }
  0x4d   : > { %v420_v16 = vpack.c.bf16 %v392_v15, %v390_v14 }
  0x55   : > { %1714 = vmatmul.msk.bf16.gmra.mxu2 %vm445_vm3, %v324_v41 }
  0x56   : > { %1682 = vmatmul.msk.bf16.gmra.mxu0 %vm445_vm3, %v417_v40 }
  0x57   : > { %1690 = vmatmul.msk.bf16.gmra.mxu1 %vm445_vm3, %v417_v40  ;;  %v727_v40 = vsel %vm724_vm4, %v725_v31, %v726_v35  ;;  %v738_v31 = vrot.slane %v2327_v9, 2 }
  0x58   : > { %1722 = vmatmul.msk.bf16.gmra.mxu3 %vm445_vm3, %v324_v41  ;;  %v729_v41 = vsel %vm724_vm4, %v726_v35, %v728_v36  ;;  %v982_v35 = vrot.slane %v2323_v7, 3  ;;  %v983_v36 = vrot.slane %v2325_v8, 3 }
  0x59   : > { %v781_v47 = vpack.c.bf16 %v729_v41, %v727_v40 }
  0x5a   : > { %v984_v40 = vsel %vm471_vm1, %v982_v35, %v983_v36  ;;  %v746_v35 = vrot.slane %v2384_v45, 2 }
  0x65   : > { %1715 = vmatmul.msk.bf16.gmra.mxu2 %vm445_vm3, %v1873_v42 }
  0x66   : > { %1683 = vmatmul.msk.bf16.gmra.mxu0 %vm445_vm3, %v418_v52 }
  0x67   : > { %1691 = vmatmul.msk.bf16.gmra.mxu1 %vm445_vm3, %v418_v52 }
  0x68   : > { %1723 = vmatmul.msk.bf16.gmra.mxu3 %vm445_vm3, %v1873_v42  ;;  %v974_v42 = vsel %vm471_vm1, %v972_v37, %v973_v38  ;;  %v985_v37 = vrot.slane %v2327_v9, 3 }
  0x69   : > { %v1028_v50 = vpack.c.bf16 %v976_v43, %v974_v42 }
  0x6a   : > { %v986_v41 = vsel %vm471_vm1, %v983_v36, %v985_v37  ;;  %v748_v36 = vrot.slane %v2386_v46, 2  ;;  %v992_v37 = vrot.slane %v2382_v44, 3 }
  0x75   : > { %1716 = vmatmul.msk.bf16.gmra.mxu2 %vm445_vm3, %v326_v2 }
  0x76   : > { %1684 = vmatmul.msk.bf16.gmra.mxu0 %vm445_vm3, %v419_v1 }
  0x77   : > { %1692 = vmatmul.msk.bf16.gmra.mxu1 %vm445_vm3, %v419_v1  ;;  %v980_v1 = vrot.slane %v2308_v61, 3 }
  0x78   : > { %1724 = vmatmul.msk.bf16.gmra.mxu3 %vm445_vm3, %v326_v2  ;;  %v732_v2 = vsel %vm724_vm4, %v730_v34, %v731_v58 }
  0x79   : > { %v981_v11 = vsel %vm471_vm1, %v978_v0, %v980_v1  ;;  %v987_v0 = vrot.slane %v2337_v17, 3  ;;  %v988_v1 = vrot.slane %v2341_v18, 3 }
  0x7a   : > { %v1029_v60 = vpack.c.bf16 %v981_v11, %v979_v4 }
  0x7b   : > { %v989_v11 = vsel %vm471_vm1, %v987_v0, %v988_v1  ;;  %v753_v0 = vrot.slane %v2402_v56, 2 }
  0x85   : > { %1717 = vmatmul.msk.bf16.gmra.mxu2 %vm445_vm3, %v1876_v3 }
  0x86   : > { %1685 = vmatmul.msk.bf16.gmra.mxu0 %vm445_vm3, %v420_v16 }
  0x87   : > { %1693 = vmatmul.msk.bf16.gmra.mxu1 %vm445_vm3, %v420_v16 }
  0x88   : > { %1725 = vmatmul.msk.bf16.gmra.mxu3 %vm445_vm3, %v1876_v3  ;;  %v734_v3 = vsel %vm724_vm4, %v731_v58, %v733_v62  ;;  %v741_v62 = vrot.slane %v2341_v18, 2 }
  0x89   : > { %v782_v14 = vpack.c.bf16 %v734_v3, %v732_v2  ;;  %v990_v2 = vrot.slane %v2343_v19, 3 }
  0x8a   : > { %v744_v4 = vsel %vm724_vm4, %v741_v62, %v743_v63  ;;  %v751_v63 = vrot.slane %v2400_v55, 2 }
  0x95   : > { %1718 = vmatmul.msk.bf16.gmra.mxu2 %vm445_vm3, %v328_v30 }
  0x96   : > { %1686 = vmatmul.msk.bf16.gmra.mxu0 %vm445_vm3, %v421_v29 }
  0x97   : > { %1694 = vmatmul.msk.bf16.gmra.mxu1 %vm445_vm3, %v421_v29 }
  0x98   : > { %1726 = vmatmul.msk.bf16.gmra.mxu3 %vm445_vm3, %v328_v30  ;;  %v736_v30 = vrot.slane %v2325_v8, 2  ;;  %v1030_v8 = vpack.c.bf16 %v986_v41, %v984_v40  ;;  %v749_v41 = vsel %vm724_vm4, %v746_v35, %v748_v36 }
  0x9a   : > { %v737_v38 = vsel %vm724_vm4, %v735_v25, %v736_v30  ;;  %v739_v39 = vsel %vm724_vm4, %v736_v30, %v738_v31  ;;  %v745_v25 = vrot.slane %v2382_v44, 2 }
  0x9c   : > { %v747_v40 = vsel %vm724_vm4, %v745_v25, %v746_v35  ;;  %v755_v25 = vrot.slane %v2417_v5, 2 }
  0xa3   : > { %v489_v48 = vpop.f32.mrf.mxu0 }
  0xa4   : > { %v538_v49 = vpop.f32.mrf.mxu1 }
  0xa5   : > { %1783 = vmatmul.msk.bf16.vlgmr.msrb.gmra.mxu2 %vm445_vm3, %v1028_v50 }
  0xa6   : > { %1747 = vmatmul.msk.bf16.vlgmr.msrb.gmra.mxu0 %vm445_vm3, %v781_v47 }
  0xa7   : > { %1755 = vmatmul.msk.bf16.vlgmr.msrb.gmra.mxu1 %vm445_vm3, %v781_v47  ;;  %v783_v47 = vpack.c.bf16 %v739_v39, %v737_v38  ;;  %v993_v38 = vrot.slane %v2384_v45, 3  ;;  %v995_v39 = vrot.slane %v2386_v46, 3 }
  0xa8   : > { %1791 = vmatmul.msk.bf16.vlgmr.msrb.gmra.mxu3 %vm445_vm3, %v1028_v50  ;;  %v635_v32 = vpop.f32.mrf.mxu2 }
  0xa9   : > { %v2465_v51 = vadd.f32 %v635_v32, %v489_v48 }
  0xab   : > { %v684_v33 = vpop.f32.mrf.mxu3  ;;  %v491_v53 = vpop.f32.mrf.mxu0 }
  0xac   : > { %v2467_v52 = vadd.f32 %v684_v33, %v538_v49  ;;  %v540_v57 = vpop.f32.mrf.mxu1  ;;  %v740_v33 = vrot.slane %v2337_v17, 2 }
  0xae   : > { %v742_v3 = vsel %vm724_vm4, %v740_v33, %v741_v62  ;;  %v750_v62 = vrot.slane %v2396_v54, 2 }
  0xb0   : > { %v637_v12 = vpop.f32.mrf.mxu2 }
  0xb1   : > { %v2478_v15 = vadd.f32 %v637_v12, %v491_v53  ;;  %v991_v12 = vsel %vm471_vm1, %v988_v1, %v990_v2  ;;  %v997_v1 = vrot.slane %v2396_v54, 3  ;;  %v998_v2 = vrot.slane %v2400_v55, 3 }
  0xb2   : > { %v1031_v18 = vpack.c.bf16 %v991_v12, %v989_v11  ;;  %v754_v11 = vsel %vm724_vm4, %v751_v63, %v753_v0 }
  0xb3   : > { %v686_v13 = vpop.f32.mrf.mxu3  ;;  %v494_v59 = vpop.f32.mrf.mxu0  ;;  %v999_v12 = vsel %vm471_vm1, %v997_v1, %v998_v2  ;;  %v760_v1 = vrot.slane %v2431_v21, 2 }
  0xb4   : > { %v2480_v16 = vadd.f32 %v686_v13, %v540_v57  ;;  %v543_v20 = vpop.f32.mrf.mxu1 }
  0xb5   : > { %1784 = vmatmul.msk.bf16.gmra.mxu2 %vm445_vm3, %v1029_v60 }
  0xb6   : > { %1748 = vmatmul.msk.bf16.gmra.mxu0 %vm445_vm3, %v782_v14 }
  0xb7   : > { %1756 = vmatmul.msk.bf16.gmra.mxu1 %vm445_vm3, %v782_v14 }
  0xb8   : > { %1792 = vmatmul.msk.bf16.gmra.mxu3 %vm445_vm3, %v1029_v60  ;;  %v640_v61 = vpop.f32.mrf.mxu2 }
  0xb9   : > { %v2487_v26 = vadd.f32 %v640_v61, %v494_v59  ;;  %v784_v59 = vpack.c.bf16 %v744_v4, %v742_v3  ;;  %v1000_v3 = vrot.slane %v2402_v56, 3  ;;  %v752_v4 = vsel %vm724_vm4, %v750_v62, %v751_v63 }
  0xbb   : > { %v689_v24 = vpop.f32.mrf.mxu3  ;;  %v496_v28 = vpop.f32.mrf.mxu0 }
  0xbc   : > { %v2489_v27 = vadd.f32 %v689_v24, %v543_v20  ;;  %v545_v29 = vpop.f32.mrf.mxu1 }
  0xc0   : > { %v642_v42 = vpop.f32.mrf.mxu2 }
  0xc1   : > { %v2500_v48 = vadd.f32 %v642_v42, %v496_v28  ;;  %v994_v42 = vsel %vm471_vm1, %v992_v37, %v993_v38  ;;  %v756_v37 = vrot.slane %v2419_v6, 2 }
  0xc3   : > { %v691_v43 = vpop.f32.mrf.mxu3  ;;  %v499_v7 = vpop.f32.mrf.mxu0 }
  0xc4   : > { %v2502_v49 = vadd.f32 %v691_v43, %v545_v29  ;;  %v548_v50 = vpop.f32.mrf.mxu1  ;;  %v996_v43 = vsel %vm471_vm1, %v993_v38, %v995_v39  ;;  %v758_v38 = vrot.slane %v2421_v10, 2  ;;  %v1002_v39 = vrot.slane %v2417_v5, 3 }
  0xc5   : > { %1785 = vmatmul.msk.bf16.gmra.mxu2 %vm445_vm3, %v1030_v8  ;;  %v1032_v46 = vpack.c.bf16 %v996_v43, %v994_v42  ;;  %v757_v42 = vsel %vm724_vm4, %v755_v25, %v756_v37 }
  0xc6   : > { %1749 = vmatmul.msk.bf16.gmra.mxu0 %vm445_vm3, %v783_v47  ;;  %v759_v43 = vsel %vm724_vm4, %v756_v37, %v758_v38 }
  0xc7   : > { %1757 = vmatmul.msk.bf16.gmra.mxu1 %vm445_vm3, %v783_v47 }
  0xc8   : > { %1793 = vmatmul.msk.bf16.gmra.mxu3 %vm445_vm3, %v1030_v8  ;;  %v645_v9 = vpop.f32.mrf.mxu2 }
  0xc9   : > { %v2509_v34 = vadd.f32 %v645_v9, %v499_v7 }
  0xcb   : > { %v694_v32 = vpop.f32.mrf.mxu3  ;;  %v501_v57 = vpop.f32.mrf.mxu0 }
  0xcc   : > { %v2511_v53 = vadd.f32 %v694_v32, %v548_v50  ;;  %v550_v58 = vpop.f32.mrf.mxu1  ;;  %v785_v50 = vpack.c.bf16 %v749_v41, %v747_v40  ;;  %v1003_v40 = vrot.slane %v2419_v6, 3  ;;  %v1005_v41 = vrot.slane %v2421_v10, 3 }
  0xd0   : > { %v647_v13 = vpop.f32.mrf.mxu2 }
  0xd1   : > { %v2522_v20 = vadd.f32 %v647_v13, %v501_v57  ;;  %v1001_v13 = vsel %vm471_vm1, %v998_v2, %v1000_v3 }
  0xd2   : > { %v1033_v55 = vpack.c.bf16 %v1001_v13, %v999_v12  ;;  %v761_v12 = vrot.slane %v2435_v22, 2  ;;  %v763_v13 = vrot.slane %v2437_v23, 2 }
  0xd3   : > { %v696_v14 = vpop.f32.mrf.mxu3  ;;  %v504_v17 = vpop.f32.mrf.mxu0 }
  0xd4   : > { %v2524_v60 = vadd.f32 %v696_v14, %v550_v58  ;;  %v553_v61 = vpop.f32.mrf.mxu1 }
  0xd5   : > { %1786 = vmatmul.msk.bf16.gmra.mxu2 %vm445_vm3, %v1031_v18 }
  0xd6   : > { %1750 = vmatmul.msk.bf16.gmra.mxu0 %vm445_vm3, %v784_v59 }
  0xd7   : > { %1758 = vmatmul.msk.bf16.gmra.mxu1 %vm445_vm3, %v784_v59 }
  0xd8   : > { %1794 = vmatmul.msk.bf16.gmra.mxu3 %vm445_vm3, %v1031_v18  ;;  %v650_v19 = vpop.f32.mrf.mxu2 }
  0xd9   : > { %v2531_v28 = vadd.f32 %v650_v19, %v504_v17  ;;  %v786_v17 = vpack.c.bf16 %v754_v11, %v752_v4 }
  0xdb   : > { %v699_v24 = vpop.f32.mrf.mxu3  ;;  %v506_v30 = vpop.f32.mrf.mxu0 }
  0xdc   : > { %v2533_v29 = vadd.f32 %v699_v24, %v553_v61  ;;  %v555_v31 = vpop.f32.mrf.mxu1 }
  0xe0   : > { %v652_v47 = vpop.f32.mrf.mxu2 }
  0xe1   : > { %v2544_v8 = vadd.f32 %v652_v47, %v506_v30  ;;  %v1004_v47 = vsel %vm471_vm1, %v1002_v39, %v1003_v40 }
  0xe3   : > { %v701_v7 = vpop.f32.mrf.mxu3  ;;  %v2548_v44 = vpop.f32.mrf.mxu0 }
  0xe4   : > { %v2546_v9 = vadd.f32 %v701_v7, %v555_v31  ;;  %v2550_v45 = vpop.f32.mrf.mxu1  ;;  %v1006_v7 = vsel %vm471_vm1, %v1003_v40, %v1005_v41 }
  0xe5   : > { %1787 = vmatmul.msk.bf16.gmra.mxu2 %vm445_vm3, %v1032_v46  ;;  %v1034_v6 = vpack.c.bf16 %v1006_v7, %v1004_v47 }
  0xe6   : > { %1751 = vmatmul.msk.bf16.gmra.mxu0 %vm445_vm3, %v785_v50 }
  0xe7   : > { %1759 = vmatmul.msk.bf16.gmra.mxu1 %vm445_vm3, %v785_v50 }
  0xe8   : > { %1795 = vmatmul.msk.bf16.gmra.mxu3 %vm445_vm3, %v1032_v46  ;;  %v2556_v32 = vpop.f32.mrf.mxu2 }
  0xeb   : > { %v2558_v33 = vpop.f32.mrf.mxu3  ;;  %v511_v57 = vpop.f32.mrf.mxu0 }
  0xec   : > { %v560_v58 = vpop.f32.mrf.mxu1 }
  0xf0   : > { %v657_v14 = vpop.f32.mrf.mxu2 }
  0xf1   : > { %v2570_v61 = vadd.f32 %v657_v14, %v511_v57  ;;  %v787_v57 = vpack.c.bf16 %v759_v43, %v757_v42  ;;  %v1007_v14 = vrot.slane %v2431_v21, 3 }
  0xf3   : > { %v706_v59 = vpop.f32.mrf.mxu3  ;;  %v514_v54 = vpop.f32.mrf.mxu0 }
  0xf4   : > { %v2572_v18 = vadd.f32 %v706_v59, %v560_v58  ;;  %v563_v19 = vpop.f32.mrf.mxu1  ;;  %v1008_v59 = vrot.slane %v2435_v22, 3 }
  0xf5   : > { %1788 = vmatmul.msk.bf16.gmra.mxu2 %vm445_vm3, %v1033_v55 }
  0xf6   : > { %1752 = vmatmul.msk.bf16.gmra.mxu0 %vm445_vm3, %v786_v17 }
  0xf7   : > { %1760 = vmatmul.msk.bf16.gmra.mxu1 %vm445_vm3, %v786_v17  ;;  %v1010_v17 = vrot.slane %v2437_v23, 3 }
  0xf8   : > { %1796 = vmatmul.msk.bf16.gmra.mxu3 %vm445_vm3, %v1033_v55  ;;  %v660_v56 = vpop.f32.mrf.mxu2  ;;  %v1009_v55 = vsel %vm471_vm1, %v1007_v14, %v1008_v59 }
  0xf9   : > { %v2579_v30 = vadd.f32 %v660_v56, %v514_v54  ;;  %v762_v54 = vsel %vm724_vm4, %v760_v1, %v761_v12  ;;  %v1011_v56 = vsel %vm471_vm1, %v1008_v59, %v1010_v17 }
  0xfa   : > { %v1035_v22 = vpack.c.bf16 %v1011_v56, %v1009_v55 }
  0xfb   : > { %v709_v24 = vpop.f32.mrf.mxu3  ;;  %v516_v35 = vpop.f32.mrf.mxu0 }
  0xfc   : > { %v2581_v31 = vadd.f32 %v709_v24, %v563_v19  ;;  %v565_v36 = vpop.f32.mrf.mxu1  ;;  %v764_v19 = vsel %vm724_vm4, %v761_v12, %v763_v13 }
 0x100   : > { %v662_v50 = vpop.f32.mrf.mxu2 }
 0x101   : > { %v2592_v58 = vadd.f32 %v662_v50, %v516_v35  ;;  %v788_v35 = vpack.c.bf16 %v764_v19, %v762_v54 }
 0x103   : > { %v711_v46 = vpop.f32.mrf.mxu3  ;;  %v519_v5 = vpop.f32.mrf.mxu0 }
 0x104   : > { %v2594_v62 = vadd.f32 %v711_v46, %v565_v36  ;;  %v568_v63 = vpop.f32.mrf.mxu1 }
 0x105   : > { %1789 = vmatmul.msk.bf16.gmra.mxu2 %vm445_vm3, %v1034_v6 }
 0x106   : > { %1753 = vmatmul.msk.bf16.gmra.mxu0 %vm445_vm3, %v787_v57 }
 0x107   : > { %1761 = vmatmul.msk.bf16.gmra.mxu1 %vm445_vm3, %v787_v57 }
 0x108   : > { %1797 = vmatmul.msk.bf16.gmra.mxu3 %vm445_vm3, %v1034_v6  ;;  %v665_v10 = vpop.f32.mrf.mxu2 }
 0x109   : > { %v2601_v2 = vadd.f32 %v665_v10, %v519_v5  ;;  %v1219_v10 = vld [vmem:[%s2819_s2] sm:$0x3] }
 0x10a   : > { %v2635_v14 = vperm.slane %v1219_v10, 1  ;;  %v2639_v54 = vperm.slane %v1219_v10, 0  ;;  %v2665_v10 = vld [vmem:[%s2820_s3 + $0x18] sm:$0xff] }
 0x10b   : > { %v714_v0 = vpop.f32.mrf.mxu3  ;;  %v521_v4 = vpop.f32.mrf.mxu0 }
 0x10c   : > { %v2603_v3 = vadd.f32 %v714_v0, %v568_v63  ;;  %v570_v11 = vpop.f32.mrf.mxu1 }
 0x110   : > { %v667_v24 = vpop.f32.mrf.mxu2 }
 0x111   : > { %v2614_v36 = vadd.f32 %v667_v24, %v521_v4 }
 0x113   : > { %v716_v25 = vpop.f32.mrf.mxu3  ;;  %v524_v21 = vpop.f32.mrf.mxu0 }
 0x114   : > { %v2616_v37 = vadd.f32 %v716_v25, %v570_v11  ;;  %v573_v38 = vpop.f32.mrf.mxu1 }
 0x115   : > { %1790 = vmatmul.msk.bf16.gmra.mxu2 %vm445_vm3, %v1035_v22 }
 0x116   : > { %1754 = vmatmul.msk.bf16.gmra.mxu0 %vm445_vm3, %v788_v35 }
 0x117   : > { %1762 = vmatmul.msk.bf16.gmra.mxu1 %vm445_vm3, %v788_v35 }
 0x118   : > { %1798 = vmatmul.msk.bf16.gmra.mxu3 %vm445_vm3, %v1035_v22  ;;  %v670_v23 = vpop.f32.mrf.mxu2 }
 0x119   : > { %v2622_v40 = vadd.f32 %v670_v23, %v524_v21 }
 0x11b   : > { %v719_v39 = vpop.f32.mrf.mxu3  ;;  %v526_v42 = vpop.f32.mrf.mxu0 }
 0x11c   : > { %v2624_v41 = vadd.f32 %v719_v39, %v573_v38  ;;  %v575_v43 = vpop.f32.mrf.mxu1 }
 0x120   : > { %v672_v47 = vpop.f32.mrf.mxu2 }
 0x121   : > { %v2626_v50 = vadd.f32 %v672_v47, %v526_v42  ;;  %v2650_v42 = vld [vmem:[%s2820_s3 + $0x8] sm:$0xff] }
 0x123   : > { %v721_v7 = vpop.f32.mrf.mxu3  ;;  %v851_v57 = vpop.f32.mrf.mxu0 }
 0x124   : > { %v2628_v46 = vadd.f32 %v721_v7, %v575_v43  ;;  %v900_v5 = vpop.f32.mrf.mxu1  ;;  %v940_v63 = vadd.f32 %v851_v57, %v2465_v51  ;;  %v1469_v51 = vld [vmem:[#allocation2 + $0x78] sm:$0xff] }
 0x125   : > { %v941_v6 = vadd.f32 %v900_v5, %v2467_v52  ;;  %v1477_v52 = vld [vmem:[#allocation2 + $0xb8] sm:$0xff]  ;;  %1522 = vmatpush.msra.mxu0 %v1469_v51  ;;  %v1467_v51 = vld [vmem:[#allocation2 + $0x68] sm:$0xff] }
 0x126   : > { %1550 = vmatpush.msra.mxu1 %v1477_v52  ;;  %v1476_v52 = vld [vmem:[#allocation2 + $0xb0] sm:$0xff] }
 0x128   : > { %v1098_v0 = vpop.f32.mrf.mxu2  ;;  %1551 = vmatpush.msra.mxu1 %v1476_v52 }
 0x129   : > { %v1187_v4 = vadd.f32 %v1098_v0, %v940_v63 }
 0x12b   : > { %v1147_v1 = vpop.f32.mrf.mxu3  ;;  %v853_v12 = vpop.f32.mrf.mxu0  ;;  %v1225_v55 = vadd.f32 %v2639_v54, %v1187_v4 }
 0x12c   : > { %v1188_v11 = vadd.f32 %v1147_v1, %v941_v6  ;;  %v902_v13 = vpop.f32.mrf.mxu1  ;;  %v942_v59 = vadd.f32 %v853_v12, %v2478_v15 }
 0x12d   : > { %v943_v17 = vadd.f32 %v902_v13, %v2480_v16 }
 0x12e   : > { %v1226_v19 = vadd.f32 %v2635_v14, %v1188_v11 }
 0x130   : > { %v1100_v56 = vpop.f32.mrf.mxu2  ;;  %1934 = vtanh.f32 %v1226_v19 }
 0x131   : > { %v1189_v25 = vadd.f32 %v1100_v56, %v942_v59  ;;  %1936 = vtanh.f32 %v1225_v55 }
 0x133   : > { %v1149_v24 = vpop.f32.mrf.mxu3  ;;  %v856_v21 = vpop.f32.mrf.mxu0  ;;  %v1227_v22 = vadd.f32 %v2639_v54, %v1189_v25 }
 0x134   : > { %v1190_v35 = vadd.f32 %v1149_v24, %v943_v17  ;;  %v905_v38 = vpop.f32.mrf.mxu1  ;;  %v944_v15 = vadd.f32 %v856_v21, %v2487_v26  ;;  %v2655_v26 = vld [vmem:[%s2820_s3] sm:$0xff]  ;;  %v1468_v17 = vld [vmem:[#allocation2 + $0x70] sm:$0xff] }
 0x135   : > { %v945_v16 = vadd.f32 %v905_v38, %v2489_v27  ;;  %1938 = vtanh.f32 %v1227_v22  ;;  %v2660_v27 = vld [vmem:[%s2820_s3 + $0x10] sm:$0xff]  ;;  %1523 = vmatpush.msra.mxu0 %v1468_v17 }
 0x136   : > { %v1228_v23 = vadd.f32 %v2635_v14, %v1190_v35  ;;  %v1935_v39 = vpop.eup %1934 }
 0x137   : > { %v1937_v7 = vpop.eup %1936  ;;  %v1294_v11 = vadd.f32 %v1935_v39, %v2650_v42  ;;  %1524 = vmatpush.msra.mxu0 %v1467_v51 }
 0x138   : > { %1940 = vtanh.f32 %v1228_v23  ;;  %v1103_v43 = vpop.f32.mrf.mxu2  ;;  %v1293_v13 = vadd.f32 %v1937_v7, %v2655_v26 }
 0x139   : > { %v1191_v57 = vadd.f32 %v1103_v43, %v944_v15 }
 0x13b   : > { %v1152_v47 = vpop.f32.mrf.mxu3  ;;  %v858_v63 = vpop.f32.mrf.mxu0  ;;  %v1229_v24 = vadd.f32 %v2639_v54, %v1191_v57 }
 0x13c   : > { %v1192_v5 = vadd.f32 %v1152_v47, %v945_v16  ;;  %v907_v6 = vpop.f32.mrf.mxu1  ;;  %v946_v0 = vadd.f32 %v858_v63, %v2500_v48  ;;  %v1939_v4 = vpop.eup %1938 }
 0x13d   : > { %v947_v1 = vadd.f32 %v907_v6, %v2502_v49  ;;  %v1295_v59 = vadd.f32 %v1939_v4, %v2660_v27  ;;  %v1333_v49 = vsel %vm1332_vm5, %v1294_v11, -inf }
 0x13e   : > { %v1941_v12 = vpop.eup %1940  ;;  %v1230_v48 = vadd.f32 %v2635_v14, %v1192_v5 }
 0x13f   : > { %v1296_v19 = vadd.f32 %v1941_v12, %v2665_v10  ;;  %v1325_v55 = vmax.f32 %v1293_v13, %v1295_v59 }
 0x140   : > { %v1105_v35 = vpop.f32.mrf.mxu2  ;;  %1942 = vtanh.f32 %v1230_v48 }
 0x141   : > { %v1334_v56 = vsel %vm1332_vm5, %v1296_v19, -inf  ;;  %v1193_v38 = vadd.f32 %v1105_v35, %v946_v0  ;;  %1944 = vtanh.f32 %v1229_v24  ;;  %v1326_v7 = vrot.slane %v1325_v55, 4 }
 0x142   : > { %v1335_v25 = vmax.f32 %v1333_v49, %v1334_v56  ;;  %v1466_v49 = vld [vmem:[#allocation2 + $0x60] sm:$0xff]  ;;  %v1465_v56 = vld [vmem:[#allocation2 + $0x58] sm:$0xff] }
 0x143   : > { %v1154_v21 = vpop.f32.mrf.mxu3  ;;  %v861_v16 = vpop.f32.mrf.mxu0  ;;  %v1231_v43 = vadd.f32 %v2639_v54, %v1193_v38  ;;  %1525 = vmatpush.msra.mxu0 %v1466_v49 }
 0x144   : > { %v1194_v15 = vadd.f32 %v1154_v21, %v947_v1  ;;  %v910_v22 = vpop.f32.mrf.mxu1  ;;  %v948_v23 = vadd.f32 %v861_v16, %v2509_v34  ;;  %v1336_v57 = vrot.slane %v1335_v25, 4  ;;  %v1327_v1 = vmax.f32 %v1325_v55, %v1326_v7  ;;  %v1475_v55 = vld [vmem:[#allocation2 + $0xa8] sm:$0xff] }
 0x145   : > { %v949_v39 = vadd.f32 %v910_v22, %v2511_v53  ;;  %1946 = vtanh.f32 %v1231_v43  ;;  %1552 = vmatpush.msra.mxu1 %v1475_v55  ;;  %1526 = vmatpush.msra.mxu0 %v1465_v56 }
 0x146   : > { %v1232_v47 = vadd.f32 %v2635_v14, %v1194_v15  ;;  %v1943_v5 = vpop.eup %1942  ;;  %v1337_v17 = vmax.f32 %v1335_v25, %v1336_v57  ;;  %v1328_v24 = vrot.slane %v1327_v1, 2 }
 0x147   : > { %v1945_v0 = vpop.eup %1944  ;;  %v1298_v51 = vadd.f32 %v1943_v5, %v2650_v42 }
 0x148   : > { %1948 = vtanh.f32 %v1232_v47  ;;  %v1108_v63 = vpop.f32.mrf.mxu2  ;;  %v1297_v19 = vadd.f32 %v1945_v0, %v2655_v26  ;;  %v1329_v43 = vmax.f32 %v1327_v1, %v1328_v24 }
 0x149   : > { %v1195_v4 = vadd.f32 %v1108_v63, %v948_v23  ;;  %v1349_v25 = vsel %vm1332_vm5, %v1298_v51, -inf }
 0x14a   : > { %v1330_v1 = vrot.slane %v1329_v43, 1 }
 0x14b   : > { %v1157_v6 = vpop.f32.mrf.mxu3  ;;  %v863_v12 = vpop.f32.mrf.mxu0  ;;  %v1233_v15 = vadd.f32 %v2639_v54, %v1195_v4 }
 0x14c   : > { %v1196_v11 = vadd.f32 %v1157_v6, %v949_v39  ;;  %v912_v34 = vpop.f32.mrf.mxu1  ;;  %v950_v53 = vadd.f32 %v863_v12, %v2522_v20  ;;  %v1947_v59 = vpop.eup %1946 }
 0x14d   : > { %v951_v13 = vadd.f32 %v912_v34, %v2524_v60  ;;  %v1299_v48 = vadd.f32 %v1947_v59, %v2660_v27  ;;  %v1338_v60 = vrot.slane %v1337_v17, 2 }
 0x14e   : > { %v1949_v52 = vpop.eup %1948  ;;  %v1234_v21 = vadd.f32 %v2635_v14, %v1196_v11 }
 0x14f   : > { %v1300_v35 = vadd.f32 %v1949_v52, %v2665_v10  ;;  %v1342_v20 = vmax.f32 %v1297_v19, %v1299_v48  ;;  %v1339_v12 = vmax.f32 %v1337_v17, %v1338_v60 }
 0x150   : > { %v1110_v23 = vpop.f32.mrf.mxu2  ;;  %1950 = vtanh.f32 %v1234_v21  ;;  %v1331_v21 = vmax.f32 %v1329_v43, %v1330_v1 }
 0x151   : > { %v1350_v38 = vsel %vm1332_vm5, %v1300_v35, -inf  ;;  %v1343_v16 = vrot.slane %v1342_v20, 4  ;;  %v1197_v47 = vadd.f32 %v1110_v23, %v950_v53  ;;  %1952 = vtanh.f32 %v1233_v15 }
 0x152   : > { %v1351_v22 = vmax.f32 %v1349_v25, %v1350_v38  ;;  %v1340_v19 = vrot.slane %v1339_v12, 1 }
 0x153   : > { %v1159_v39 = vpop.f32.mrf.mxu3  ;;  %v866_v57 = vpop.f32.mrf.mxu0  ;;  %v1344_v63 = vmax.f32 %v1342_v20, %v1343_v16  ;;  %v1235_v4 = vadd.f32 %v2639_v54, %v1197_v47  ;;  %v1464_v47 = vld [vmem:[#allocation2 + $0x50] sm:$0xff] }
 0x154   : > { %v1198_v7 = vadd.f32 %v1159_v39, %v951_v13  ;;  %v915_v5 = vpop.f32.mrf.mxu1  ;;  %v1352_v6 = vrot.slane %v1351_v22, 4  ;;  %v952_v0 = vadd.f32 %v866_v57, %v2531_v28  ;;  %v1341_v15 = vmax.f32 %v1339_v12, %v1340_v19  ;;  %v1474_v57 = vld [vmem:[#allocation2 + $0xa0] sm:$0xff]  ;;  %1527 = vmatpush.msra.mxu0 %v1464_v47 }
 0x155   : > { %v953_v11 = vadd.f32 %v915_v5, %v2533_v29  ;;  %v1345_v59 = vrot.slane %v1344_v63, 2  ;;  %1954 = vtanh.f32 %v1235_v4  ;;  %1553 = vmatpush.msra.mxu1 %v1474_v57 }
 0x156   : > { %v1236_v34 = vadd.f32 %v2635_v14, %v1198_v7  ;;  %v1353_v51 = vmax.f32 %v1351_v22, %v1352_v6  ;;  %v1951_v52 = vpop.eup %1950  ;;  %v1463_v7 = vld [vmem:[#allocation2 + $0x48] sm:$0xff] }
 0x157   : > { %v1346_v53 = vmax.f32 %v1344_v63, %v1345_v59  ;;  %v1953_v29 = vpop.eup %1952  ;;  %v1302_v25 = vadd.f32 %v1951_v52, %v2650_v42  ;;  %1528 = vmatpush.msra.mxu0 %v1463_v7 }
 0x158   : > { %v1354_v13 = vrot.slane %v1353_v51, 2  ;;  %1956 = vtanh.f32 %v1236_v34  ;;  %v1113_v28 = vpop.f32.mrf.mxu2  ;;  %v1301_v23 = vadd.f32 %v1953_v29, %v2655_v26 }
 0x159   : > { %v1347_v48 = vrot.slane %v1346_v53, 1  ;;  %v1199_v17 = vadd.f32 %v1113_v28, %v952_v0  ;;  %v1365_v6 = vsel %vm1332_vm5, %v1302_v25, -inf }
 0x15a   : > { %v1355_v49 = vmax.f32 %v1353_v51, %v1354_v13 }
 0x15b   : > { %v1162_v56 = vpop.f32.mrf.mxu3  ;;  %v868_v24 = vpop.f32.mrf.mxu0  ;;  %v1348_v20 = vmax.f32 %v1346_v53, %v1347_v48  ;;  %v1237_v4 = vadd.f32 %v2639_v54, %v1199_v17 }
 0x15c   : > { %v1200_v55 = vadd.f32 %v1162_v56, %v953_v11  ;;  %v917_v35 = vpop.f32.mrf.mxu1  ;;  %v1356_v60 = vrot.slane %v1355_v49, 1  ;;  %v1955_v38 = vpop.eup %1954  ;;  %v954_v34 = vadd.f32 %v868_v24, %v2544_v8 }
 0x15d   : > { %v1303_v39 = vadd.f32 %v1955_v38, %v2660_v27  ;;  %v1499_v5 = vsel %vm1498_vm6, %v1348_v20, %v1331_v21  ;;  %v955_v59 = vadd.f32 %v917_v35, %v2546_v9  ;;  %v705_v9 = vadd.f32 %v2558_v33, %v2550_v45 }
 0x15e   : > { %v1957_v16 = vpop.eup %1956  ;;  %v1357_v22 = vmax.f32 %v1355_v49, %v1356_v60  ;;  %v1238_v43 = vadd.f32 %v2635_v14, %v1200_v55  ;;  %v656_v20 = vadd.f32 %v2556_v32, %v2548_v44 }
 0x15f   : > { %v1304_v63 = vadd.f32 %v1957_v16, %v2665_v10  ;;  %v1358_v0 = vmax.f32 %v1301_v23, %v1303_v39 }
 0x160   : > { %v1512_v11 = vsel %vm1498_vm6, %v1357_v22, %v1341_v15  ;;  %v1115_v53 = vpop.f32.mrf.mxu2  ;;  %1958 = vtanh.f32 %v1238_v43 }
 0x161   : > { %v1366_v12 = vsel %vm1332_vm5, %v1304_v63, -inf  ;;  %v1359_v51 = vrot.slane %v1358_v0, 4  ;;  %v1201_v52 = vadd.f32 %v1115_v53, %v954_v34  ;;  %1960 = vtanh.f32 %v1237_v4  ;;  %v1461_v4 = vld [vmem:[#allocation2 + $0x38] sm:$0xff] }
 0x162   : > { %v1367_v1 = vmax.f32 %v1365_v6, %v1366_v12  ;;  %v1462_v12 = vld [vmem:[#allocation2 + $0x40] sm:$0xff]  ;;  %v1473_v34 = vld [vmem:[#allocation2 + $0x98] sm:$0xff] }
 0x163   : > { %v1164_v13 = vpop.f32.mrf.mxu3  ;;  %v871_v48 = vpop.f32.mrf.mxu0  ;;  %v1360_v28 = vmax.f32 %v1358_v0, %v1359_v51  ;;  %v1239_v29 = vadd.f32 %v2639_v54, %v1201_v52  ;;  %1529 = vmatpush.msra.mxu0 %v1462_v12  ;;  %1554 = vmatpush.msra.mxu1 %v1473_v34 }
 0x164   : > { %v1202_v19 = vadd.f32 %v1164_v13, %v955_v59  ;;  %v920_v49 = vpop.f32.mrf.mxu1  ;;  %v1368_v56 = vrot.slane %v1367_v1, 4  ;;  %v956_v23 = vadd.f32 %v871_v48, %v656_v20 }
 0x165   : > { %v1361_v8 = vrot.slane %v1360_v28, 2  ;;  %1962 = vtanh.f32 %v1239_v29  ;;  %v957_v60 = vadd.f32 %v920_v49, %v705_v9  ;;  %1530 = vmatpush.msra.mxu0 %v1461_v4 }
 0x166   : > { %v1240_v17 = vadd.f32 %v2635_v14, %v1202_v19  ;;  %v1369_v55 = vmax.f32 %v1367_v1, %v1368_v56  ;;  %v1959_v21 = vpop.eup %1958 }
 0x167   : > { %v1362_v24 = vmax.f32 %v1360_v28, %v1361_v8  ;;  %v1961_v22 = vpop.eup %1960  ;;  %v1306_v57 = vadd.f32 %v1959_v21, %v2650_v42 }
 0x168   : > { %v1370_v35 = vrot.slane %v1369_v55, 2  ;;  %1964 = vtanh.f32 %v1240_v17  ;;  %v1118_v15 = vpop.f32.mrf.mxu2  ;;  %v1305_v44 = vadd.f32 %v1961_v22, %v2655_v26 }
 0x169   : > { %v1363_v25 = vrot.slane %v1362_v24, 1  ;;  %v1203_v43 = vadd.f32 %v1118_v15, %v956_v23  ;;  %v1381_v53 = vsel %vm1332_vm5, %v1306_v57, -inf }
 0x16a   : > { %v1371_v38 = vmax.f32 %v1369_v55, %v1370_v35 }
 0x16b   : > { %v1167_v16 = vpop.f32.mrf.mxu3  ;;  %v873_v47 = vpop.f32.mrf.mxu0  ;;  %v1364_v45 = vmax.f32 %v1362_v24, %v1363_v25  ;;  %v1241_v48 = vadd.f32 %v2639_v54, %v1203_v43 }
 0x16c   : > { %v1204_v39 = vadd.f32 %v1167_v16, %v957_v60  ;;  %v922_v7 = vpop.f32.mrf.mxu1  ;;  %v1372_v33 = vrot.slane %v1371_v38, 1  ;;  %v1963_v63 = vpop.eup %1962  ;;  %v958_v49 = vadd.f32 %v873_v47, %v2570_v61 }
 0x16d   : > { %v1307_v32 = vadd.f32 %v1963_v63, %v2660_v27  ;;  %v1501_v59 = vsel %vm1500_vm7, %v1364_v45, %v1499_v5  ;;  %v959_v28 = vadd.f32 %v922_v7, %v2572_v18 }
 0x16e   : > { %v1965_v6 = vpop.eup %1964  ;;  %v1373_v0 = vmax.f32 %v1371_v38, %v1372_v33  ;;  %v1242_v1 = vadd.f32 %v2635_v14, %v1204_v39 }
 0x16f   : > { %v1308_v51 = vadd.f32 %v1965_v6, %v2665_v10  ;;  %v1374_v13 = vmax.f32 %v1305_v44, %v1307_v32  ;;  %v1459_v44 = vld [vmem:[#allocation2 + $0x28] sm:$0xff]  ;;  %v1472_v32 = vld [vmem:[#allocation2 + $0x90] sm:$0xff] }
 0x170   : > { %v1513_v52 = vsel %vm1500_vm7, %v1373_v0, %v1512_v11  ;;  %v1120_v29 = vpop.f32.mrf.mxu2  ;;  %1966 = vtanh.f32 %v1242_v1  ;;  %v1460_v0 = vld [vmem:[#allocation2 + $0x30] sm:$0xff]  ;;  %1555 = vmatpush.msra.mxu1 %v1472_v32 }
 0x171   : > { %v1382_v19 = vsel %vm1332_vm5, %v1308_v51, -inf  ;;  %v1375_v5 = vrot.slane %v1374_v13, 4  ;;  %v1205_v8 = vadd.f32 %v1120_v29, %v958_v49  ;;  %1968 = vtanh.f32 %v1241_v48  ;;  %1531 = vmatpush.msra.mxu0 %v1460_v0 }
 0x172   : > { %v1383_v56 = vmax.f32 %v1381_v53, %v1382_v19 }
 0x173   : > { %v1169_v17 = vpop.f32.mrf.mxu3  ;;  %v876_v9 = vpop.f32.mrf.mxu0  ;;  %v1376_v35 = vmax.f32 %v1374_v13, %v1375_v5  ;;  %v1243_v21 = vadd.f32 %v2639_v54, %v1205_v8  ;;  %1532 = vmatpush.msra.mxu0 %v1459_v44 }
 0x174   : > { %v1206_v55 = vadd.f32 %v1169_v17, %v959_v28  ;;  %v925_v24 = vpop.f32.mrf.mxu1  ;;  %v1384_v11 = vrot.slane %v1383_v56, 4  ;;  %v960_v7 = vadd.f32 %v876_v9, %v2579_v30 }
 0x175   : > { %v1377_v61 = vrot.slane %v1376_v35, 2  ;;  %1970 = vtanh.f32 %v1243_v21  ;;  %v961_v15 = vadd.f32 %v925_v24, %v2581_v31 }
 0x176   : > { %v1244_v20 = vadd.f32 %v2635_v14, %v1206_v55  ;;  %v1385_v60 = vmax.f32 %v1383_v56, %v1384_v11  ;;  %v1967_v38 = vpop.eup %1966 }
 0x177   : > { %v1378_v18 = vmax.f32 %v1376_v35, %v1377_v61  ;;  %v1969_v47 = vpop.eup %1968  ;;  %v1310_v6 = vadd.f32 %v1967_v38, %v2650_v42 }
 0x178   : > { %v1386_v25 = vrot.slane %v1385_v60, 2  ;;  %1972 = vtanh.f32 %v1244_v20  ;;  %v1123_v23 = vpop.f32.mrf.mxu2  ;;  %v1309_v51 = vadd.f32 %v1969_v47, %v2655_v26  ;;  %v1457_v47 = vld [vmem:[#allocation2 + $0x18] sm:$0xff] }
 0x179   : > { %v1379_v16 = vrot.slane %v1378_v18, 1  ;;  %v1207_v31 = vadd.f32 %v1123_v23, %v960_v7  ;;  %v1397_v19 = vsel %vm1332_vm5, %v1310_v6, -inf  ;;  %v1471_v7 = vld [vmem:[#allocation2 + $0x88] sm:$0xff] }
 0x17a   : > { %v1387_v22 = vmax.f32 %v1385_v60, %v1386_v25  ;;  %1556 = vmatpush.msra.mxu1 %v1471_v7 }
 0x17b   : > { %v1172_v39 = vpop.f32.mrf.mxu3  ;;  %v878_v33 = vpop.f32.mrf.mxu0  ;;  %v1380_v63 = vmax.f32 %v1378_v18, %v1379_v16  ;;  %v1245_v5 = vadd.f32 %v2639_v54, %v1207_v31 }
 0x17c   : > { %v1208_v45 = vadd.f32 %v1172_v39, %v961_v15  ;;  %v927_v57 = vpop.f32.mrf.mxu1  ;;  %v1388_v43 = vrot.slane %v1387_v22, 1  ;;  %v1971_v12 = vpop.eup %1970  ;;  %v962_v56 = vadd.f32 %v878_v33, %v2592_v58  ;;  %v1458_v39 = vld [vmem:[#allocation2 + $0x20] sm:$0xff] }
 0x17d   : > { %v1311_v30 = vadd.f32 %v1971_v12, %v2660_v27  ;;  %v1503_v1 = vsel %vm1502_vm8, %v1380_v63, %v1501_v59  ;;  %v963_v29 = vadd.f32 %v927_v57, %v2594_v62  ;;  %1533 = vmatpush.msra.mxu0 %v1458_v39 }
 0x17e   : > { %v1973_v4 = vpop.eup %1972  ;;  %v1389_v34 = vmax.f32 %v1387_v22, %v1388_v43  ;;  %v1246_v13 = vadd.f32 %v2635_v14, %v1208_v45 }
 0x17f   : > { %v1312_v53 = vadd.f32 %v1973_v4, %v2665_v10  ;;  %v1390_v48 = vmax.f32 %v1309_v51, %v1311_v30  ;;  %1534 = vmatpush.msra.mxu0 %v1457_v47 }
 0x180   : > { %v1514_v49 = vsel %vm1502_vm8, %v1389_v34, %v1513_v52  ;;  %v1125_v8 = vpop.f32.mrf.mxu2  ;;  %1974 = vtanh.f32 %v1246_v13 }
 0x181   : > { %v1398_v28 = vsel %vm1332_vm5, %v1312_v53, -inf  ;;  %v1391_v17 = vrot.slane %v1390_v48, 4  ;;  %v1209_v9 = vadd.f32 %v1125_v8, %v962_v56  ;;  %1976 = vtanh.f32 %v1245_v5 }
 0x182   : > { %v1399_v59 = vmax.f32 %v1397_v19, %v1398_v28 }
 0x183   : > { %v1174_v55 = vpop.f32.mrf.mxu3  ;;  %v881_v35 = vpop.f32.mrf.mxu0  ;;  %v1392_v21 = vmax.f32 %v1390_v48, %v1391_v17  ;;  %v1247_v52 = vadd.f32 %v2639_v54, %v1209_v9 }
 0x184   : > { %v1210_v24 = vadd.f32 %v1174_v55, %v963_v29  ;;  %v930_v11 = vpop.f32.mrf.mxu1  ;;  %v1400_v20 = vrot.slane %v1399_v59, 4  ;;  %v964_v33 = vadd.f32 %v881_v35, %v2601_v2 }
 0x185   : > { %v1393_v60 = vrot.slane %v1392_v21, 2  ;;  %1978 = vtanh.f32 %v1247_v52  ;;  %v965_v38 = vadd.f32 %v930_v11, %v2603_v3  ;;  %v1456_v52 = vld [vmem:[#allocation2 + $0x10] sm:$0xff] }
 0x186   : > { %v1248_v61 = vadd.f32 %v2635_v14, %v1210_v24  ;;  %v1401_v58 = vmax.f32 %v1399_v59, %v1400_v20  ;;  %v1975_v25 = vpop.eup %1974  ;;  %1535 = vmatpush.msra.mxu0 %v1456_v52 }
 0x187   : > { %v1394_v62 = vmax.f32 %v1392_v21, %v1393_v60  ;;  %v1977_v45 = vpop.eup %1976  ;;  %v1314_v0 = vadd.f32 %v1975_v25, %v2650_v42 }
 0x188   : > { %v1402_v18 = vrot.slane %v1401_v58, 2  ;;  %1980 = vtanh.f32 %v1248_v61  ;;  %v1128_v22 = vpop.f32.mrf.mxu2  ;;  %v1313_v4 = vadd.f32 %v1977_v45, %v2655_v26  ;;  %v1470_v61 = vld [vmem:[#allocation2 + $0x80] sm:$0xff] }
 0x189   : > { %v1395_v15 = vrot.slane %v1394_v62, 1  ;;  %v1211_v32 = vadd.f32 %v1128_v22, %v964_v33  ;;  %v1413_v53 = vsel %vm1332_vm5, %v1314_v0, -inf  ;;  %1557 = vmatpush.msra.mxu1 %v1470_v61 }
 0x18a   : > { %v1403_v16 = vmax.f32 %v1401_v58, %v1402_v18 }
 0x18b   : > { %v1177_v23 = vpop.f32.mrf.mxu3  ;;  %v883_v63 = vpop.f32.mrf.mxu0  ;;  %v1396_v3 = vmax.f32 %v1394_v62, %v1395_v15  ;;  %v1249_v28 = vadd.f32 %v2639_v54, %v1211_v32  ;;  %v1454_v62 = vld [vmem:[#allocation2] sm:$0xff] }
 0x18c   : > { %v1212_v57 = vadd.f32 %v1177_v23, %v965_v38  ;;  %v932_v43 = vpop.f32.mrf.mxu1  ;;  %v1404_v6 = vrot.slane %v1403_v16, 1  ;;  %v1979_v44 = vpop.eup %1978  ;;  %v966_v5 = vadd.f32 %v883_v63, %v2614_v36 }
 0x18d   : > { %v1315_v34 = vadd.f32 %v1979_v44, %v2660_v27  ;;  %v1505_v2 = vsel %vm1504_vm9, %v1396_v3, %v1503_v1  ;;  %v967_v56 = vadd.f32 %v932_v43, %v2616_v37  ;;  %v1455_v37 = vld [vmem:[#allocation2 + $0x8] sm:$0xff] }
 0x18e   : > { %v1981_v12 = vpop.eup %1980  ;;  %v1405_v31 = vmax.f32 %v1403_v16, %v1404_v6  ;;  %v1250_v30 = vadd.f32 %v2635_v14, %v1212_v57  ;;  %1536 = vmatpush.msra.mxu0 %v1455_v37 }
 0x18f   : > { %v1316_v51 = vadd.f32 %v1981_v12, %v2665_v10  ;;  %v1406_v13 = vmax.f32 %v1313_v4, %v1315_v34 }
 0x190   : > { %v1515_v19 = vsel %vm1504_vm9, %v1405_v31, %v1514_v49  ;;  %v1130_v1 = vpop.f32.mrf.mxu2  ;;  %1982 = vtanh.f32 %v1250_v30  ;;  %1537 = vmatpush.msra.mxu0 %v1454_v62 }
 0x191   : > { %v1414_v48 = vsel %vm1332_vm5, %v1316_v51, -inf  ;;  %v1407_v29 = vrot.slane %v1406_v13, 4  ;;  %v1213_v8 = vadd.f32 %v1130_v1, %v966_v5  ;;  %1984 = vtanh.f32 %v1249_v28 }
 0x192   : > { %v1415_v17 = vmax.f32 %v1413_v53, %v1414_v48 }
 0x193   : > { %v1179_v59 = vpop.f32.mrf.mxu3  ;;  %v1408_v9 = vmax.f32 %v1406_v13, %v1407_v29  ;;  %v886_v35 = vpop.f32.mrf.mxu0  ;;  %v1251_v49 = vadd.f32 %v2639_v54, %v1213_v8 }
 0x194   : > { %v1214_v55 = vadd.f32 %v1179_v59, %v967_v56  ;;  %v1416_v24 = vrot.slane %v1415_v17, 4  ;;  %v935_v11 = vpop.f32.mrf.mxu1  ;;  %v968_v39 = vadd.f32 %v886_v35, %v2622_v40 }
 0x195   : > { %v1409_v20 = vrot.slane %v1408_v9, 2  ;;  %1986 = vtanh.f32 %v1251_v49  ;;  %v969_v38 = vadd.f32 %v935_v11, %v2624_v41 }
 0x196   : > { %v1252_v21 = vadd.f32 %v2635_v14, %v1214_v55  ;;  %v1417_v36 = vmax.f32 %v1415_v17, %v1416_v24  ;;  %v1983_v18 = vpop.eup %1982 }
 0x197   : > { %v1410_v60 = vmax.f32 %v1408_v9, %v1409_v20  ;;  %v1985_v23 = vpop.eup %1984  ;;  %v1318_v7 = vadd.f32 %v1983_v18, %v2650_v42 }
 0x198   : > { %v1418_v58 = vrot.slane %v1417_v36, 2  ;;  %1988 = vtanh.f32 %v1252_v21  ;;  %v1133_v15 = vpop.f32.mrf.mxu2  ;;  %v1317_v6 = vadd.f32 %v1985_v23, %v2655_v26 }
 0x199   : > { %v1411_v22 = vrot.slane %v1410_v60, 1  ;;  %v1215_v63 = vadd.f32 %v1133_v15, %v968_v39  ;;  %v1429_v12 = vsel %vm1332_vm5, %v1318_v7, -inf }
 0x19a   : > { %v1419_v25 = vmax.f32 %v1417_v36, %v1418_v58 }
 0x19b   : > { %v1182_v16 = vpop.f32.mrf.mxu3  ;;  %v1412_v33 = vmax.f32 %v1410_v60, %v1411_v22  ;;  %v1987_v57 = vpop.eup %1986  ;;  %v1253_v30 = vadd.f32 %v2639_v54, %v1215_v63  ;;  %v1933_v63 = vld [vmem:[%s2822_s5] ss:$0 sm:$0xff] }
 0x19c   : > { %v1420_v47 = vrot.slane %v1419_v25, 1  ;;  %v1216_v45 = vadd.f32 %v1182_v16, %v969_v38  ;;  %v1319_v41 = vadd.f32 %v1987_v57, %v2660_v27  ;;  %v888_v0 = vpop.f32.mrf.mxu0  ;;  %v937_v3 = vpop.f32.mrf.mxu1 }
 0x19d   : > { %v1507_v44 = vsel %vm1506_vm10, %v1412_v33, %v1505_v2  ;;  %v970_v53 = vadd.f32 %v888_v0, %v2626_v50  ;;  %v971_v13 = vadd.f32 %v937_v3, %v2628_v46 }
 0x19e   : > { %v1989_v43 = vpop.eup %1988  ;;  %v1421_v32 = vmax.f32 %v1419_v25, %v1420_v47  ;;  %v1422_v31 = vmax.f32 %v1317_v6, %v1319_v41  ;;  %v1254_v4 = vadd.f32 %v2635_v14, %v1216_v45 }
 0x19f   : > { %v1320_v40 = vadd.f32 %v1989_v43, %v2665_v10 }
 0x1a0   : > { %v1516_v34 = vsel %vm1506_vm10, %v1421_v32, %v1515_v19  ;;  %v1423_v48 = vrot.slane %v1422_v31, 4  ;;  %v1135_v28 = vpop.f32.mrf.mxu2  ;;  %1990 = vtanh.f32 %v1254_v4 }
 0x1a1   : > { %v1430_v51 = vsel %vm1332_vm5, %v1320_v40, -inf  ;;  %v1217_v56 = vadd.f32 %v1135_v28, %v970_v53  ;;  %1992 = vtanh.f32 %v1253_v30 }
 0x1a2   : > { %v1431_v2 = vmax.f32 %v1429_v12, %v1430_v51  ;;  %v1424_v17 = vmax.f32 %v1422_v31, %v1423_v48 }
 0x1a3   : > { %v1184_v5 = vpop.f32.mrf.mxu3  ;;  %v1255_v19 = vadd.f32 %v2639_v54, %v1217_v56 }
 0x1a4   : > { %v1218_v29 = vadd.f32 %v1184_v5, %v971_v13  ;;  %v1432_v1 = vrot.slane %v1431_v2, 4  ;;  %v1425_v8 = vrot.slane %v1424_v17, 2 }
 0x1a5   : > { %1994 = vtanh.f32 %v1255_v19 }
 0x1a6   : > { %v1256_v59 = vadd.f32 %v2635_v14, %v1218_v29  ;;  %v1433_v55 = vmax.f32 %v1431_v2, %v1432_v1  ;;  %v1426_v46 = vmax.f32 %v1424_v17, %v1425_v8  ;;  %v1991_v9 = vpop.eup %1990 }
 0x1a7   : > { %v1993_v11 = vpop.eup %1992  ;;  %v1322_v36 = vadd.f32 %v1991_v9, %v2650_v42 }
 0x1a8   : > { %v1434_v50 = vrot.slane %v1433_v55, 2  ;;  %1996 = vtanh.f32 %v1256_v59  ;;  %v1427_v35 = vrot.slane %v1426_v46, 1  ;;  %v1321_v54 = vadd.f32 %v1993_v11, %v2655_v26 }
 0x1a9   : > { %v1445_v18 = vsel %vm1332_vm5, %v1322_v36, -inf }
 0x1aa   : > { %v1435_v24 = vmax.f32 %v1433_v55, %v1434_v50  ;;  %v1428_v49 = vmax.f32 %v1426_v46, %v1427_v35 }
 0x1ab   : > { %v1995_v20 = vpop.eup %1994 }
 0x1ac   : > { %v1436_v21 = vrot.slane %v1435_v24, 1  ;;  %v1323_v14 = vadd.f32 %v1995_v20, %v2660_v27  ;;  %v1509_v37 = vsel %vm1508_vm11, %v1428_v49, %v1507_v44 }
 0x1ae   : > { %v1997_v52 = vpop.eup %1996  ;;  %v1437_v61 = vmax.f32 %v1435_v24, %v1436_v21  ;;  %v1438_v58 = vmax.f32 %v1321_v54, %v1323_v14 }
 0x1af   : > { %v1324_v60 = vadd.f32 %v1997_v52, %v2665_v10 }
 0x1b0   : > { %v1517_v62 = vsel %vm1508_vm11, %v1437_v61, %v1516_v34  ;;  %v1439_v38 = vrot.slane %v1438_v58, 4 }
 0x1b1   : > { %v1446_v25 = vsel %vm1332_vm5, %v1324_v60, -inf }
 0x1b2   : > { %v1447_v15 = vmax.f32 %v1445_v18, %v1446_v25  ;;  %v1440_v16 = vmax.f32 %v1438_v58, %v1439_v38 }
 0x1b4   : > { %v1448_v42 = vrot.slane %v1447_v15, 4  ;;  %v1441_v23 = vrot.slane %v1440_v16, 2 }
 0x1b6   : > { %v1449_v22 = vmax.f32 %v1447_v15, %v1448_v42  ;;  %v1442_v26 = vmax.f32 %v1440_v16, %v1441_v23 }
 0x1b8   : > { %v1450_v27 = vrot.slane %v1449_v22, 2  ;;  %v1443_v39 = vrot.slane %v1442_v26, 1 }
 0x1ba   : > { %v1451_v47 = vmax.f32 %v1449_v22, %v1450_v27  ;;  %v1444_v10 = vmax.f32 %v1442_v26, %v1443_v39 }
 0x1bc   : > { %v1452_v7 = vrot.slane %v1451_v47, 1  ;;  %v1511_v45 = vsel %vm1510_vm12, %v1444_v10, %v1509_v37 }
 0x1bd   : > { %1538 = vmatmul.f32.vlgmr.msra.gmra.mxu0 %v1511_v45 }
 0x1be   : > { %v1453_v33 = vmax.f32 %v1451_v47, %v1452_v7 }
 0x1c0   : > { %v1518_v57 = vsel %vm1510_vm12, %v1453_v33, %v1517_v62 }
 0x1c1   : > { %1799 = vmatmul.msk.f32.vlgmr.msra.gmra.mxu1 %vm1332_vm5, %v1518_v57 }
 0x23a   : > { %v1539_v43 = vpop.f32.mrf.mxu0 }
 0x23b   : > { %v1540_v6 = vadd.f32 %v1933_v63, %v1539_v43 }
 0x23e   : > { %v1559_v41 = vpop.f32.mrf.mxu1 }
 0x23f   : > { %v1560_v0 = vadd.f32 %v1559_v41, %v1540_v6 }
 0x241   : > { %1562 = vst [vmem:[%s264_s15] sm:$0xff] %v1560_v0 }
 0x242   : > { %2055 = shalt.err (!%p2052_p8)
}
 0x243   : > { %1884 = dma.vmem_to_hbm [thread:$0]  (%p2173_p5), %s1577_s18, 128, %s1579_s17, %s1564_s19  }
 0x244 PF: > { %p1896_p9 = scmp.ge.s32.totalorder %s2094_s24, 2  ;;  %s1590_s29 = sand.u32 1, %s2082_s21  }
 0x245   : > { %s1591_s12 = scalar_lea.sflag [#allocation4], %s1590_s29 }
 0x246   : > { %p1891_p10 = pnand %p1896_p9, %p2177_p6 }
 0x248   : > { %p1892_p11 = pneg %p1891_p10 }
 0x24a   : > { %2077 = dma.done.wait (%p1892_p11), %s1591_s12, 128  }
 0x24b   : > { %2079 = vsyncadd (%p1892_p11), %s1591_s12, 4294967168  ;;  %p17_p12 = scmp.ge.s32.totalorder %s2160_s27, 4   ;;  %s2826_s21 = smov %s2086_s22 }
 0x24c   : > { %s2827_s22 = smov %s2090_s23  ;;  %s2828_s23 = smov %s2171_s30 }
 0x24d   : > { %s2829_s24 = smov %s2160_s27  ;;  %19 = sbr.rel (!%p17_p12) target bundleno = 4 (0x4), region = 87 }
 0x252   :  { %1597 = vsyncpa [#allocation3], 1 }
 0x253   :  { %1599 = vsyncpa [#allocation3 + $0x1], 1 }
 0x254   :  { %1600 = vsyncpa [#allocation4], 1 }
 0x255   :  { %1602 = vsyncpa [#allocation4 + $0x1], 1 }

</bundles_post_ra>
